<compile_context>
chip_gen: v7x
topology: tpu7x:2x2x1
jax: 0.10.0
libtpu: 0.0.40
codegen_flags: <defaults>
</compile_context>

<pallas_src>
import jax
import jax.numpy as jnp
from jax.experimental import pallas as pl
from jax.experimental.pallas import tpu as pltpu

HIDDEN = 32
INPUT_DIM = 1
OUTPUT_DIM = 1
NUM_LAYERS = 2  # hard-coded as two stacked cells in the kernel


def _lstm_kernel(x_ref, wih0_ref, b0_ref, whh0_ref, wih1_ref, whh1_ref, b1_ref,
                 wfc_ref, bfc_ref, out_ref, xp_ref):
    H = HIDDEN
    T, B, _ = x_ref.shape

    # Layer-0 input projection for all timesteps at once. INPUT_DIM == 1, so
    # x @ W_ih0 is exactly a broadcast multiply; fold the layer-0 bias in here.
    # The g-gate columns already carry the x2 tanh-via-sigmoid scaling from the
    # host-side reorder, so no extra work is needed in the loop.
    xp_ref[...] = (x_ref[...] * wih0_ref[...][None, :, :]
                   + b0_ref[...][None, :, :])                    # (T, B, 4H) f32

    # Hoist loop-invariant weight loads / bias broadcast out of the recurrence.
    whh0 = whh0_ref[...]                                         # (H, 4H)  bf16
    wih1 = wih1_ref[...]                                         # (H, 4H)  bf16
    whh1 = whh1_ref[...]                                         # (H, 4H)  bf16
    b1b = jnp.broadcast_to(b1_ref[...], (B, 4 * H))              # (B, 4H)  f32

    def lstm_act(gates, c_prev):
        # gate columns are (i, f, o, g); the g pre-activation is pre-scaled by
        # 2 so a single sigmoid over all 4H lanes covers every gate and
        # g = 2*sigmoid(2x) - 1 == tanh(x).
        s = jax.nn.sigmoid(gates)                                # (B, 4H)
        i, f, o = s[:, :H], s[:, H:2 * H], s[:, 2 * H:3 * H]
        g = 2.0 * s[:, 3 * H:] - 1.0
        c_new = f * c_prev + i * g
        h_new = o * jnp.tanh(c_new)
        return h_new, c_new

    def body(t, carry):
        h0, c0, h1, c1 = carry
        # Layer-1 recurrent partial FIRST: it depends only on the previous
        # step's h1, so its MXU fill/drain overlaps all of layer-0's work.
        g1p = jnp.dot(h1.astype(jnp.bfloat16), whh1,
                      preferred_element_type=jnp.float32) + b1b
        # ---- layer 0: gates = xp[t] + h0 @ W_hh0 ----
        g0 = xp_ref[t] + jnp.dot(h0.astype(jnp.bfloat16), whh0,
                                 preferred_element_type=jnp.float32)
        h0, c0 = lstm_act(g0, c0)
        # ---- layer 1: gates = g1p + h0_new @ W_ih1 ----
        g1 = g1p + jnp.dot(h0.astype(jnp.bfloat16), wih1,
                           preferred_element_type=jnp.float32)
        h1, c1 = lstm_act(g1, c1)
        return (h0, c0, h1, c1)

    zero = jnp.zeros((B, H), jnp.float32)
    # T is static and small here; full unroll gives the LLO scheduler
    # visibility.  (Switch to a bounded unroll if T ever grows large.)
    _, _, h1, _ = jax.lax.fori_loop(0, T, body, (zero, zero, zero, zero),
                                    unroll=True)

    # fc on the last timestep's layer-1 hidden state: out = h1_T @ W_fc + b_fc
    out_ref[...] = (jnp.dot(h1.astype(jnp.bfloat16), wfc_ref[...],
                            preferred_element_type=jnp.float32)
                    + bfc_ref[...])


def lstm_pallas(x, p):
    B, T, D = x.shape
    assert D == INPUT_DIM == 1  # kernel exploits input_dim == 1 for the x-proj
    H = HIDDEN
    x_tm = jnp.transpose(x, (1, 0, 2)).astype(jnp.float32)       # (T, B, D)

    def reorder(w):
        # gate columns (i, f, g, o) -> (i, f, o, g), with the g columns scaled
        # by 2 so tanh(g) can be recovered from the single-sigmoid pass.
        return jnp.concatenate(
            [w[..., :2 * H], w[..., 3 * H:4 * H], 2.0 * w[..., 2 * H:3 * H]],
            axis=-1)

    wih0 = reorder(p['wih0'])                                    # (D, 4H) f32
    b0 = reorder(p['b0'])                                        # (1, 4H) f32
    whh0 = reorder(p['whh0']).astype(jnp.bfloat16)               # (H, 4H) bf16
    wih1 = reorder(p['wih1']).astype(jnp.bfloat16)               # (H, 4H) bf16
    whh1 = reorder(p['whh1']).astype(jnp.bfloat16)               # (H, 4H) bf16
    b1 = reorder(p['b1'])                                        # (1, 4H) f32
    wfc = p['wfc'].astype(jnp.bfloat16)                          # (H, 1)  bf16

    vmem = pl.BlockSpec(memory_space=pltpu.MemorySpace.VMEM)
    return pl.pallas_call(
        _lstm_kernel,
        out_shape=jax.ShapeDtypeStruct((B, OUTPUT_DIM), jnp.float32),
        in_specs=[vmem] * 9,
        out_specs=vmem,
        scratch_shapes=[
            # xp: x @ W_ih0 + b0 for all timesteps (<100 KB here).  If this is
            # ever scaled to large T*B, store it bf16 or chunk over T so it
            # stays under v7x's 64 MiB VMEM.
            pltpu.VMEM((T, B, 4 * H), jnp.float32),
        ],
    )(x_tm, wih0, b0, whh0, wih1, whh1, b1, wfc, p['bfc'])


def lstm_ref(x, p):
    """Pure-JAX reference with identical semantics (PyTorch gate order, f32)."""
    H = HIDDEN
    B, T, D = x.shape
    x_tm = jnp.transpose(x, (1, 0, 2)).astype(jnp.float32)

    def cell(inp, h, c, wih, whh, b):
        g = inp @ wih + h @ whh + b
        i = jax.nn.sigmoid(g[:, 0 * H:1 * H])
        f = jax.nn.sigmoid(g[:, 1 * H:2 * H])
        gg = jnp.tanh(g[:, 2 * H:3 * H])
        o = jax.nn.sigmoid(g[:, 3 * H:4 * H])
        c_new = f * c + i * gg
        return o * jnp.tanh(c_new), c_new

    def step(carry, xt):
        h0, c0, h1, c1 = carry
        h0, c0 = cell(xt, h0, c0, p['wih0'], p['whh0'], p['b0'])
        h1, c1 = cell(h0, h1, c1, p['wih1'], p['whh1'], p['b1'])
        return (h0, c0, h1, c1), None

    z = jnp.zeros((B, H), jnp.float32)
    (h0, c0, h1, c1), _ = jax.lax.scan(step, (z, z, z, z), x_tm)
    return h1 @ p['wfc'] + p['bfc']


def init_params(key):
    k = 1.0 / (HIDDEN ** 0.5)
    ks = jax.random.split(key, 12)
    u = lambda kk, shape: jax.random.uniform(kk, shape, jnp.float32, -k, k)
    return {
        'wih0': u(ks[0], (INPUT_DIM, 4 * HIDDEN)),
        'whh0': u(ks[1], (HIDDEN, 4 * HIDDEN)),
        'b0':   u(ks[2], (1, 4 * HIDDEN)) + u(ks[3], (1, 4 * HIDDEN)),  # b_ih + b_hh
        'wih1': u(ks[4], (HIDDEN, 4 * HIDDEN)),
        'whh1': u(ks[5], (HIDDEN, 4 * HIDDEN)),
        'b1':   u(ks[6], (1, 4 * HIDDEN)) + u(ks[7], (1, 4 * HIDDEN)),
        'wfc':  u(ks[8], (HIDDEN, OUTPUT_DIM)),
        'bfc':  u(ks[9], (1, OUTPUT_DIM)),
    }


if __name__ == "__main__":
    key = jax.random.PRNGKey(0)
    kx, kp = jax.random.split(key)
    B, T = 2, 8
    x = jax.random.normal(kx, (B, T, INPUT_DIM), jnp.float32)  # (batch, seq, input_dim)
    params = init_params(kp)

    out = jax.block_until_ready(lstm_pallas(x, params))
    ref = jax.block_until_ready(lstm_ref(x, params))

    assert out.shape == (B, OUTPUT_DIM)
    # bf16 matmul operands (f32 accumulation) -> slightly looser tolerance
    assert jnp.allclose(out, ref, atol=2e-2, rtol=2e-2), (out, ref)
    print("KERNEL_OK")
</pallas_src>

<mosaic_0001>
module attributes {stable_mosaic.version = 11 : i64} {
  func.func @_lstm_kernel(%arg0: memref<8x2x1xf32, #tpu.memory_space<vmem>>, %arg1: memref<1x128xf32, #tpu.memory_space<vmem>>, %arg2: memref<1x128xf32, #tpu.memory_space<vmem>>, %arg3: memref<32x128xbf16, #tpu.memory_space<vmem>>, %arg4: memref<32x128xbf16, #tpu.memory_space<vmem>>, %arg5: memref<32x128xbf16, #tpu.memory_space<vmem>>, %arg6: memref<1x128xf32, #tpu.memory_space<vmem>>, %arg7: memref<32x1xbf16, #tpu.memory_space<vmem>>, %arg8: memref<1x1xf32, #tpu.memory_space<vmem>>, %arg9: memref<2x1xf32, #tpu.memory_space<vmem>>, %arg10: memref<8x2x128xf32, #tpu.memory_space<vmem>>) attributes {dimension_semantics = [], scalar_prefetch = 0 : i64, scratch_operands = 1 : i64, tpu.core_type = #tpu.core_type<tc>} {
    %c0 = arith.constant 0 : index
    %c0_0 = arith.constant 0 : index
    %c0_1 = arith.constant 0 : index
    %0 = vector.load %arg0[%c0, %c0_0, %c0_1] : memref<8x2x1xf32, #tpu.memory_space<vmem>>, vector<8x2x1xf32>
    %c0_2 = arith.constant 0 : index
    %c0_3 = arith.constant 0 : index
    %1 = vector.load %arg1[%c0_2, %c0_3] : memref<1x128xf32, #tpu.memory_space<vmem>>, vector<1x128xf32>
    %2 = vector.shape_cast %1 : vector<1x128xf32> to vector<1x1x128xf32>
    %3 = vector.broadcast %0 : vector<8x2x1xf32> to vector<8x2x128xf32>
    %4 = vector.broadcast %2 : vector<1x1x128xf32> to vector<8x2x128xf32>
    %5 = arith.mulf %3, %4 : vector<8x2x128xf32>
    %c0_4 = arith.constant 0 : index
    %c0_5 = arith.constant 0 : index
    %6 = vector.load %arg2[%c0_4, %c0_5] : memref<1x128xf32, #tpu.memory_space<vmem>>, vector<1x128xf32>
    %7 = vector.shape_cast %6 : vector<1x128xf32> to vector<1x1x128xf32>
    %8 = vector.broadcast %7 : vector<1x1x128xf32> to vector<8x2x128xf32>
    %9 = arith.addf %5, %8 : vector<8x2x128xf32>
    %c0_6 = arith.constant 0 : index
    %c0_7 = arith.constant 0 : index
    %c0_8 = arith.constant 0 : index
    %10 = vector.load %arg10[%c0_6, %c0_7, %c0_8] : memref<8x2x128xf32, #tpu.memory_space<vmem>>, vector<8x2x128xf32>
    tpu.vector_store %arg10[%c0_6, %c0_7, %c0_8], %9 {strides = array<i32>} : memref<8x2x128xf32, #tpu.memory_space<vmem>>, vector<8x2x128xf32>,
    %c0_9 = arith.constant 0 : index
    %c0_10 = arith.constant 0 : index
    %11 = vector.load %arg3[%c0_9, %c0_10] : memref<32x128xbf16, #tpu.memory_space<vmem>>, vector<32x128xbf16>
    %c0_11 = arith.constant 0 : index
    %c0_12 = arith.constant 0 : index
    %12 = vector.load %arg4[%c0_11, %c0_12] : memref<32x128xbf16, #tpu.memory_space<vmem>>, vector<32x128xbf16>
    %c0_13 = arith.constant 0 : index
    %c0_14 = arith.constant 0 : index
    %13 = vector.load %arg5[%c0_13, %c0_14] : memref<32x128xbf16, #tpu.memory_space<vmem>>, vector<32x128xbf16>
    %c0_15 = arith.constant 0 : index
    %c0_16 = arith.constant 0 : index
    %14 = vector.load %arg6[%c0_15, %c0_16] : memref<1x128xf32, #tpu.memory_space<vmem>>, vector<1x128xf32>
    %15 = vector.shape_cast %14 : vector<1x128xf32> to vector<1x128xf32>
    %16 = vector.broadcast %15 : vector<1x128xf32> to vector<2x128xf32>
    %cst = arith.constant 0.000000e+00 : f32
    %17 = vector.broadcast %cst : f32 to vector<2x32xf32>
    %c0_i32 = arith.constant 0 : i32
    %18 = arith.truncf %17 : vector<2x32xf32> to vector<2x32xbf16>
    %cst_17 = arith.constant dense<0.000000e+00> : vector<2x128xf32>
    %19 = tpu.matmul %18, %13, %cst_17 {dimension_numbers = #tpu.dot_dimension_numbers<[1], [0], [0], [1], [0, 0, 1, 1], [], []>} : vector<2x32xbf16>, vector<32x128xbf16>, vector<2x128xf32> -> vector<2x128xf32>
    %20 = arith.addf %19, %16 : vector<2x128xf32>
    %21 = arith.index_cast %c0_i32 : i32 to index
    %c0_18 = arith.constant 0 : index
    %c0_19 = arith.constant 0 : index
    %22 = vector.load %arg10[%21, %c0_18, %c0_19] : memref<8x2x128xf32, #tpu.memory_space<vmem>>, vector<1x2x128xf32>
    %23 = vector.shape_cast %22 : vector<1x2x128xf32> to vector<2x128xf32>
    %24 = arith.truncf %17 : vector<2x32xf32> to vector<2x32xbf16>
    %cst_20 = arith.constant dense<0.000000e+00> : vector<2x128xf32>
    %25 = tpu.matmul %24, %11, %cst_20 {dimension_numbers = #tpu.dot_dimension_numbers<[1], [0], [0], [1], [0, 0, 1, 1], [], []>} : vector<2x32xbf16>, vector<32x128xbf16>, vector<2x128xf32> -> vector<2x128xf32>
    %26 = arith.addf %23, %25 : vector<2x128xf32>
    %27 = arith.negf %26 : vector<2x128xf32>
    %28 = math.exp %27 : vector<2x128xf32>
    %cst_21 = arith.constant 1.000000e+00 : f32
    %29 = vector.broadcast %cst_21 : f32 to vector<2x128xf32>
    %30 = arith.addf %29, %28 : vector<2x128xf32>
    %31 = arith.divf %29, %30 : vector<2x128xf32>
    %32 = vector.extract_strided_slice %31 {offsets = [0, 0], sizes = [2, 32], strides = [1, 1]} : vector<2x128xf32> to vector<2x32xf32>
    %33 = vector.extract_strided_slice %31 {offsets = [0, 32], sizes = [2, 32], strides = [1, 1]} : vector<2x128xf32> to vector<2x32xf32>
    %34 = vector.extract_strided_slice %31 {offsets = [0, 64], sizes = [2, 32], strides = [1, 1]} : vector<2x128xf32> to vector<2x32xf32>
    %35 = vector.extract_strided_slice %31 {offsets = [0, 96], sizes = [2, 32], strides = [1, 1]} : vector<2x128xf32> to vector<2x32xf32>
    %cst_22 = arith.constant 2.000000e+00 : f32
    %36 = vector.broadcast %cst_22 : f32 to vector<2x32xf32>
    %37 = arith.mulf %36, %35 : vector<2x32xf32>
    %cst_23 = arith.constant 1.000000e+00 : f32
    %38 = vector.broadcast %cst_23 : f32 to vector<2x32xf32>
    %39 = arith.subf %37, %38 : vector<2x32xf32>
    %40 = arith.mulf %33, %17 : vector<2x32xf32>
    %41 = arith.mulf %32, %39 : vector<2x32xf32>
    %42 = arith.addf %40, %41 : vector<2x32xf32>
    %43 = math.tanh %42 : vector<2x32xf32>
    %44 = arith.mulf %34, %43 : vector<2x32xf32>
    %45 = arith.truncf %44 : vector<2x32xf32> to vector<2x32xbf16>
    %cst_24 = arith.constant dense<0.000000e+00> : vector<2x128xf32>
    %46 = tpu.matmul %45, %12, %cst_24 {dimension_numbers = #tpu.dot_dimension_numbers<[1], [0], [0], [1], [0, 0, 1, 1], [], []>} : vector<2x32xbf16>, vector<32x128xbf16>, vector<2x128xf32> -> vector<2x128xf32>
    %47 = arith.addf %20, %46 : vector<2x128xf32>
    %48 = arith.negf %47 : vector<2x128xf32>
    %49 = math.exp %48 : vector<2x128xf32>
    %cst_25 = arith.constant 1.000000e+00 : f32
    %50 = vector.broadcast %cst_25 : f32 to vector<2x128xf32>
    %51 = arith.addf %50, %49 : vector<2x128xf32>
    %52 = arith.divf %50, %51 : vector<2x128xf32>
    %53 = vector.extract_strided_slice %52 {offsets = [0, 0], sizes = [2, 32], strides = [1, 1]} : vector<2x128xf32> to vector<2x32xf32>
    %54 = vector.extract_strided_slice %52 {offsets = [0, 32], sizes = [2, 32], strides = [1, 1]} : vector<2x128xf32> to vector<2x32xf32>
    %55 = vector.extract_strided_slice %52 {offsets = [0, 64], sizes = [2, 32], strides = [1, 1]} : vector<2x128xf32> to vector<2x32xf32>
    %56 = vector.extract_strided_slice %52 {offsets = [0, 96], sizes = [2, 32], strides = [1, 1]} : vector<2x128xf32> to vector<2x32xf32>
    %cst_26 = arith.constant 2.000000e+00 : f32
    %57 = vector.broadcast %cst_26 : f32 to vector<2x32xf32>
    %58 = arith.mulf %57, %56 : vector<2x32xf32>
    %cst_27 = arith.constant 1.000000e+00 : f32
    %59 = vector.broadcast %cst_27 : f32 to vector<2x32xf32>
    %60 = arith.subf %58, %59 : vector<2x32xf32>
    %61 = arith.mulf %54, %17 : vector<2x32xf32>
    %62 = arith.mulf %53, %60 : vector<2x32xf32>
    %63 = arith.addf %61, %62 : vector<2x32xf32>
    %64 = math.tanh %63 : vector<2x32xf32>
    %65 = arith.mulf %55, %64 : vector<2x32xf32>
    %c1_i32 = arith.constant 1 : i32
    %66 = arith.truncf %65 : vector<2x32xf32> to vector<2x32xbf16>
    %cst_28 = arith.constant dense<0.000000e+00> : vector<2x128xf32>
    %67 = tpu.matmul %66, %13, %cst_28 {dimension_numbers = #tpu.dot_dimension_numbers<[1], [0], [0], [1], [0, 0, 1, 1], [], []>} : vector<2x32xbf16>, vector<32x128xbf16>, vector<2x128xf32> -> vector<2x128xf32>
    %68 = arith.addf %67, %16 : vector<2x128xf32>
    %69 = arith.index_cast %c1_i32 : i32 to index
    %c0_29 = arith.constant 0 : index
    %c0_30 = arith.constant 0 : index
    %70 = vector.load %arg10[%69, %c0_29, %c0_30] : memref<8x2x128xf32, #tpu.memory_space<vmem>>, vector<1x2x128xf32>
    %71 = vector.shape_cast %70 : vector<1x2x128xf32> to vector<2x128xf32>
    %72 = arith.truncf %44 : vector<2x32xf32> to vector<2x32xbf16>
    %cst_31 = arith.constant dense<0.000000e+00> : vector<2x128xf32>
    %73 = tpu.matmul %72, %11, %cst_31 {dimension_numbers = #tpu.dot_dimension_numbers<[1], [0], [0], [1], [0, 0, 1, 1], [], []>} : vector<2x32xbf16>, vector<32x128xbf16>, vector<2x128xf32> -> vector<2x128xf32>
    %74 = arith.addf %71, %73 : vector<2x128xf32>
    %75 = arith.negf %74 : vector<2x128xf32>
    %76 = math.exp %75 : vector<2x128xf32>
    %cst_32 = arith.constant 1.000000e+00 : f32
    %77 = vector.broadcast %cst_32 : f32 to vector<2x128xf32>
    %78 = arith.addf %77, %76 : vector<2x128xf32>
    %79 = arith.divf %77, %78 : vector<2x128xf32>
    %80 = vector.extract_strided_slice %79 {offsets = [0, 0], sizes = [2, 32], strides = [1, 1]} : vector<2x128xf32> to vector<2x32xf32>
    %81 = vector.extract_strided_slice %79 {offsets = [0, 32], sizes = [2, 32], strides = [1, 1]} : vector<2x128xf32> to vector<2x32xf32>
    %82 = vector.extract_strided_slice %79 {offsets = [0, 64], sizes = [2, 32], strides = [1, 1]} : vector<2x128xf32> to vector<2x32xf32>
    %83 = vector.extract_strided_slice %79 {offsets = [0, 96], sizes = [2, 32], strides = [1, 1]} : vector<2x128xf32> to vector<2x32xf32>
    %cst_33 = arith.constant 2.000000e+00 : f32
    %84 = vector.broadcast %cst_33 : f32 to vector<2x32xf32>
    %85 = arith.mulf %84, %83 : vector<2x32xf32>
    %cst_34 = arith.constant 1.000000e+00 : f32
    %86 = vector.broadcast %cst_34 : f32 to vector<2x32xf32>
    %87 = arith.subf %85, %86 : vector<2x32xf32>
    %88 = arith.mulf %81, %42 : vector<2x32xf32>
    %89 = arith.mulf %80, %87 : vector<2x32xf32>
    %90 = arith.addf %88, %89 : vector<2x32xf32>
    %91 = math.tanh %90 : vector<2x32xf32>
    %92 = arith.mulf %82, %91 : vector<2x32xf32>
    %93 = arith.truncf %92 : vector<2x32xf32> to vector<2x32xbf16>
    %cst_35 = arith.constant dense<0.000000e+00> : vector<2x128xf32>
    %94 = tpu.matmul %93, %12, %cst_35 {dimension_numbers = #tpu.dot_dimension_numbers<[1], [0], [0], [1], [0, 0, 1, 1], [], []>} : vector<2x32xbf16>, vector<32x128xbf16>, vector<2x128xf32> -> vector<2x128xf32>
    %95 = arith.addf %68, %94 : vector<2x128xf32>
    %96 = arith.negf %95 : vector<2x128xf32>
    %97 = math.exp %96 : vector<2x128xf32>
    %cst_36 = arith.constant 1.000000e+00 : f32
    %98 = vector.broadcast %cst_36 : f32 to vector<2x128xf32>
    %99 = arith.addf %98, %97 : vector<2x128xf32>
    %100 = arith.divf %98, %99 : vector<2x128xf32>
    %101 = vector.extract_strided_slice %100 {offsets = [0, 0], sizes = [2, 32], strides = [1, 1]} : vector<2x128xf32> to vector<2x32xf32>
    %102 = vector.extract_strided_slice %100 {offsets = [0, 32], sizes = [2, 32], strides = [1, 1]} : vector<2x128xf32> to vector<2x32xf32>
    %103 = vector.extract_strided_slice %100 {offsets = [0, 64], sizes = [2, 32], strides = [1, 1]} : vector<2x128xf32> to vector<2x32xf32>
    %104 = vector.extract_strided_slice %100 {offsets = [0, 96], sizes = [2, 32], strides = [1, 1]} : vector<2x128xf32> to vector<2x32xf32>
    %cst_37 = arith.constant 2.000000e+00 : f32
    %105 = vector.broadcast %cst_37 : f32 to vector<2x32xf32>
    %106 = arith.mulf %105, %104 : vector<2x32xf32>
    %cst_38 = arith.constant 1.000000e+00 : f32
    %107 = vector.broadcast %cst_38 : f32 to vector<2x32xf32>
    %108 = arith.subf %106, %107 : vector<2x32xf32>
    %109 = arith.mulf %102, %63 : vector<2x32xf32>
    %110 = arith.mulf %101, %108 : vector<2x32xf32>
    %111 = arith.addf %109, %110 : vector<2x32xf32>
    %112 = math.tanh %111 : vector<2x32xf32>
    %113 = arith.mulf %103, %112 : vector<2x32xf32>
    %c2_i32 = arith.constant 2 : i32
    %114 = arith.truncf %113 : vector<2x32xf32> to vector<2x32xbf16>
    %cst_39 = arith.constant dense<0.000000e+00> : vector<2x128xf32>
    %115 = tpu.matmul %114, %13, %cst_39 {dimension_numbers = #tpu.dot_dimension_numbers<[1], [0], [0], [1], [0, 0, 1, 1], [], []>} : vector<2x32xbf16>, vector<32x128xbf16>, vector<2x128xf32> -> vector<2x128xf32>
    %116 = arith.addf %115, %16 : vector<2x128xf32>
    %117 = arith.index_cast %c2_i32 : i32 to index
    %c0_40 = arith.constant 0 : index
    %c0_41 = arith.constant 0 : index
    %118 = vector.load %arg10[%117, %c0_40, %c0_41] : memref<8x2x128xf32, #tpu.memory_space<vmem>>, vector<1x2x128xf32>
    %119 = vector.shape_cast %118 : vector<1x2x128xf32> to vector<2x128xf32>
    %120 = arith.truncf %92 : vector<2x32xf32> to vector<2x32xbf16>
    %cst_42 = arith.constant dense<0.000000e+00> : vector<2x128xf32>
    %121 = tpu.matmul %120, %11, %cst_42 {dimension_numbers = #tpu.dot_dimension_numbers<[1], [0], [0], [1], [0, 0, 1, 1], [], []>} : vector<2x32xbf16>, vector<32x128xbf16>, vector<2x128xf32> -> vector<2x128xf32>
    %122 = arith.addf %119, %121 : vector<2x128xf32>
    %123 = arith.negf %122 : vector<2x128xf32>
    %124 = math.exp %123 : vector<2x128xf32>
    %cst_43 = arith.constant 1.000000e+00 : f32
    %125 = vector.broadcast %cst_43 : f32 to vector<2x128xf32>
    %126 = arith.addf %125, %124 : vector<2x128xf32>
    %127 = arith.divf %125, %126 : vector<2x128xf32>
    %128 = vector.extract_strided_slice %127 {offsets = [0, 0], sizes = [2, 32], strides = [1, 1]} : vector<2x128xf32> to vector<2x32xf32>
    %129 = vector.extract_strided_slice %127 {offsets = [0, 32], sizes = [2, 32], strides = [1, 1]} : vector<2x128xf32> to vector<2x32xf32>
    %130 = vector.extract_strided_slice %127 {offsets = [0, 64], sizes = [2, 32], strides = [1, 1]} : vector<2x128xf32> to vector<2x32xf32>
    %131 = vector.extract_strided_slice %127 {offsets = [0, 96], sizes = [2, 32], strides = [1, 1]} : vector<2x128xf32> to vector<2x32xf32>
    %cst_44 = arith.constant 2.000000e+00 : f32
    %132 = vector.broadcast %cst_44 : f32 to vector<2x32xf32>
    %133 = arith.mulf %132, %131 : vector<2x32xf32>
    %cst_45 = arith.constant 1.000000e+00 : f32
    %134 = vector.broadcast %cst_45 : f32 to vector<2x32xf32>
    %135 = arith.subf %133, %134 : vector<2x32xf32>
    %136 = arith.mulf %129, %90 : vector<2x32xf32>
    %137 = arith.mulf %128, %135 : vector<2x32xf32>
    %138 = arith.addf %136, %137 : vector<2x32xf32>
    %139 = math.tanh %138 : vector<2x32xf32>
    %140 = arith.mulf %130, %139 : vector<2x32xf32>
    %141 = arith.truncf %140 : vector<2x32xf32> to vector<2x32xbf16>
    %cst_46 = arith.constant dense<0.000000e+00> : vector<2x128xf32>
    %142 = tpu.matmul %141, %12, %cst_46 {dimension_numbers = #tpu.dot_dimension_numbers<[1], [0], [0], [1], [0, 0, 1, 1], [], []>} : vector<2x32xbf16>, vector<32x128xbf16>, vector<2x128xf32> -> vector<2x128xf32>
    %143 = arith.addf %116, %142 : vector<2x128xf32>
    %144 = arith.negf %143 : vector<2x128xf32>
    %145 = math.exp %144 : vector<2x128xf32>
    %cst_47 = arith.constant 1.000000e+00 : f32
    %146 = vector.broadcast %cst_47 : f32 to vector<2x128xf32>
    %147 = arith.addf %146, %145 : vector<2x128xf32>
    %148 = arith.divf %146, %147 : vector<2x128xf32>
    %149 = vector.extract_strided_slice %148 {offsets = [0, 0], sizes = [2, 32], strides = [1, 1]} : vector<2x128xf32> to vector<2x32xf32>
    %150 = vector.extract_strided_slice %148 {offsets = [0, 32], sizes = [2, 32], strides = [1, 1]} : vector<2x128xf32> to vector<2x32xf32>
    %151 = vector.extract_strided_slice %148 {offsets = [0, 64], sizes = [2, 32], strides = [1, 1]} : vector<2x128xf32> to vector<2x32xf32>
    %152 = vector.extract_strided_slice %148 {offsets = [0, 96], sizes = [2, 32], strides = [1, 1]} : vector<2x128xf32> to vector<2x32xf32>
    %cst_48 = arith.constant 2.000000e+00 : f32
    %153 = vector.broadcast %cst_48 : f32 to vector<2x32xf32>
    %154 = arith.mulf %153, %152 : vector<2x32xf32>
    %cst_49 = arith.constant 1.000000e+00 : f32
    %155 = vector.broadcast %cst_49 : f32 to vector<2x32xf32>
    %156 = arith.subf %154, %155 : vector<2x32xf32>
    %157 = arith.mulf %150, %111 : vector<2x32xf32>
    %158 = arith.mulf %149, %156 : vector<2x32xf32>
    %159 = arith.addf %157, %158 : vector<2x32xf32>
    %160 = math.tanh %159 : vector<2x32xf32>
    %161 = arith.mulf %151, %160 : vector<2x32xf32>
    %c3_i32 = arith.constant 3 : i32
    %162 = arith.truncf %161 : vector<2x32xf32> to vector<2x32xbf16>
    %cst_50 = arith.constant dense<0.000000e+00> : vector<2x128xf32>
    %163 = tpu.matmul %162, %13, %cst_50 {dimension_numbers = #tpu.dot_dimension_numbers<[1], [0], [0], [1], [0, 0, 1, 1], [], []>} : vector<2x32xbf16>, vector<32x128xbf16>, vector<2x128xf32> -> vector<2x128xf32>
    %164 = arith.addf %163, %16 : vector<2x128xf32>
    %165 = arith.index_cast %c3_i32 : i32 to index
    %c0_51 = arith.constant 0 : index
    %c0_52 = arith.constant 0 : index
    %166 = vector.load %arg10[%165, %c0_51, %c0_52] : memref<8x2x128xf32, #tpu.memory_space<vmem>>, vector<1x2x128xf32>
    %167 = vector.shape_cast %166 : vector<1x2x128xf32> to vector<2x128xf32>
    %168 = arith.truncf %140 : vector<2x32xf32> to vector<2x32xbf16>
    %cst_53 = arith.constant dense<0.000000e+00> : vector<2x128xf32>
    %169 = tpu.matmul %168, %11, %cst_53 {dimension_numbers = #tpu.dot_dimension_numbers<[1], [0], [0], [1], [0, 0, 1, 1], [], []>} : vector<2x32xbf16>, vector<32x128xbf16>, vector<2x128xf32> -> vector<2x128xf32>
    %170 = arith.addf %167, %169 : vector<2x128xf32>
    %171 = arith.negf %170 : vector<2x128xf32>
    %172 = math.exp %171 : vector<2x128xf32>
    %cst_54 = arith.constant 1.000000e+00 : f32
    %173 = vector.broadcast %cst_54 : f32 to vector<2x128xf32>
    %174 = arith.addf %173, %172 : vector<2x128xf32>
    %175 = arith.divf %173, %174 : vector<2x128xf32>
    %176 = vector.extract_strided_slice %175 {offsets = [0, 0], sizes = [2, 32], strides = [1, 1]} : vector<2x128xf32> to vector<2x32xf32>
    %177 = vector.extract_strided_slice %175 {offsets = [0, 32], sizes = [2, 32], strides = [1, 1]} : vector<2x128xf32> to vector<2x32xf32>
    %178 = vector.extract_strided_slice %175 {offsets = [0, 64], sizes = [2, 32], strides = [1, 1]} : vector<2x128xf32> to vector<2x32xf32>
    %179 = vector.extract_strided_slice %175 {offsets = [0, 96], sizes = [2, 32], strides = [1, 1]} : vector<2x128xf32> to vector<2x32xf32>
    %cst_55 = arith.constant 2.000000e+00 : f32
    %180 = vector.broadcast %cst_55 : f32 to vector<2x32xf32>
    %181 = arith.mulf %180, %179 : vector<2x32xf32>
    %cst_56 = arith.constant 1.000000e+00 : f32
    %182 = vector.broadcast %cst_56 : f32 to vector<2x32xf32>
    %183 = arith.subf %181, %182 : vector<2x32xf32>
    %184 = arith.mulf %177, %138 : vector<2x32xf32>
    %185 = arith.mulf %176, %183 : vector<2x32xf32>
    %186 = arith.addf %184, %185 : vector<2x32xf32>
    %187 = math.tanh %186 : vector<2x32xf32>
    %188 = arith.mulf %178, %187 : vector<2x32xf32>
    %189 = arith.truncf %188 : vector<2x32xf32> to vector<2x32xbf16>
    %cst_57 = arith.constant dense<0.000000e+00> : vector<2x128xf32>
    %190 = tpu.matmul %189, %12, %cst_57 {dimension_numbers = #tpu.dot_dimension_numbers<[1], [0], [0], [1], [0, 0, 1, 1], [], []>} : vector<2x32xbf16>, vector<32x128xbf16>, vector<2x128xf32> -> vector<2x128xf32>
    %191 = arith.addf %164, %190 : vector<2x128xf32>
    %192 = arith.negf %191 : vector<2x128xf32>
    %193 = math.exp %192 : vector<2x128xf32>
    %cst_58 = arith.constant 1.000000e+00 : f32
    %194 = vector.broadcast %cst_58 : f32 to vector<2x128xf32>
    %195 = arith.addf %194, %193 : vector<2x128xf32>
    %196 = arith.divf %194, %195 : vector<2x128xf32>
    %197 = vector.extract_strided_slice %196 {offsets = [0, 0], sizes = [2, 32], strides = [1, 1]} : vector<2x128xf32> to vector<2x32xf32>
    %198 = vector.extract_strided_slice %196 {offsets = [0, 32], sizes = [2, 32], strides = [1, 1]} : vector<2x128xf32> to vector<2x32xf32>
    %199 = vector.extract_strided_slice %196 {offsets = [0, 64], sizes = [2, 32], strides = [1, 1]} : vector<2x128xf32> to vector<2x32xf32>
    %200 = vector.extract_strided_slice %196 {offsets = [0, 96], sizes = [2, 32], strides = [1, 1]} : vector<2x128xf32> to vector<2x32xf32>
    %cst_59 = arith.constant 2.000000e+00 : f32
    %201 = vector.broadcast %cst_59 : f32 to vector<2x32xf32>
    %202 = arith.mulf %201, %200 : vector<2x32xf32>
    %cst_60 = arith.constant 1.000000e+00 : f32
    %203 = vector.broadcast %cst_60 : f32 to vector<2x32xf32>
    %204 = arith.subf %202, %203 : vector<2x32xf32>
    %205 = arith.mulf %198, %159 : vector<2x32xf32>
    %206 = arith.mulf %197, %204 : vector<2x32xf32>
    %207 = arith.addf %205, %206 : vector<2x32xf32>
    %208 = math.tanh %207 : vector<2x32xf32>
    %209 = arith.mulf %199, %208 : vector<2x32xf32>
    %c4_i32 = arith.constant 4 : i32
    %210 = arith.truncf %209 : vector<2x32xf32> to vector<2x32xbf16>
    %cst_61 = arith.constant dense<0.000000e+00> : vector<2x128xf32>
    %211 = tpu.matmul %210, %13, %cst_61 {dimension_numbers = #tpu.dot_dimension_numbers<[1], [0], [0], [1], [0, 0, 1, 1], [], []>} : vector<2x32xbf16>, vector<32x128xbf16>, vector<2x128xf32> -> vector<2x128xf32>
    %212 = arith.addf %211, %16 : vector<2x128xf32>
    %213 = arith.index_cast %c4_i32 : i32 to index
    %c0_62 = arith.constant 0 : index
    %c0_63 = arith.constant 0 : index
    %214 = vector.load %arg10[%213, %c0_62, %c0_63] : memref<8x2x128xf32, #tpu.memory_space<vmem>>, vector<1x2x128xf32>
    %215 = vector.shape_cast %214 : vector<1x2x128xf32> to vector<2x128xf32>
    %216 = arith.truncf %188 : vector<2x32xf32> to vector<2x32xbf16>
    %cst_64 = arith.constant dense<0.000000e+00> : vector<2x128xf32>
    %217 = tpu.matmul %216, %11, %cst_64 {dimension_numbers = #tpu.dot_dimension_numbers<[1], [0], [0], [1], [0, 0, 1, 1], [], []>} : vector<2x32xbf16>, vector<32x128xbf16>, vector<2x128xf32> -> vector<2x128xf32>
    %218 = arith.addf %215, %217 : vector<2x128xf32>
    %219 = arith.negf %218 : vector<2x128xf32>
    %220 = math.exp %219 : vector<2x128xf32>
    %cst_65 = arith.constant 1.000000e+00 : f32
    %221 = vector.broadcast %cst_65 : f32 to vector<2x128xf32>
    %222 = arith.addf %221, %220 : vector<2x128xf32>
    %223 = arith.divf %221, %222 : vector<2x128xf32>
    %224 = vector.extract_strided_slice %223 {offsets = [0, 0], sizes = [2, 32], strides = [1, 1]} : vector<2x128xf32> to vector<2x32xf32>
    %225 = vector.extract_strided_slice %223 {offsets = [0, 32], sizes = [2, 32], strides = [1, 1]} : vector<2x128xf32> to vector<2x32xf32>
    %226 = vector.extract_strided_slice %223 {offsets = [0, 64], sizes = [2, 32], strides = [1, 1]} : vector<2x128xf32> to vector<2x32xf32>
    %227 = vector.extract_strided_slice %223 {offsets = [0, 96], sizes = [2, 32], strides = [1, 1]} : vector<2x128xf32> to vector<2x32xf32>
    %cst_66 = arith.constant 2.000000e+00 : f32
    %228 = vector.broadcast %cst_66 : f32 to vector<2x32xf32>
    %229 = arith.mulf %228, %227 : vector<2x32xf32>
    %cst_67 = arith.constant 1.000000e+00 : f32
    %230 = vector.broadcast %cst_67 : f32 to vector<2x32xf32>
    %231 = arith.subf %229, %230 : vector<2x32xf32>
    %232 = arith.mulf %225, %186 : vector<2x32xf32>
    %233 = arith.mulf %224, %231 : vector<2x32xf32>
    %234 = arith.addf %232, %233 : vector<2x32xf32>
    %235 = math.tanh %234 : vector<2x32xf32>
    %236 = arith.mulf %226, %235 : vector<2x32xf32>
    %237 = arith.truncf %236 : vector<2x32xf32> to vector<2x32xbf16>
    %cst_68 = arith.constant dense<0.000000e+00> : vector<2x128xf32>
    %238 = tpu.matmul %237, %12, %cst_68 {dimension_numbers = #tpu.dot_dimension_numbers<[1], [0], [0], [1], [0, 0, 1, 1], [], []>} : vector<2x32xbf16>, vector<32x128xbf16>, vector<2x128xf32> -> vector<2x128xf32>
    %239 = arith.addf %212, %238 : vector<2x128xf32>
    %240 = arith.negf %239 : vector<2x128xf32>
    %241 = math.exp %240 : vector<2x128xf32>
    %cst_69 = arith.constant 1.000000e+00 : f32
    %242 = vector.broadcast %cst_69 : f32 to vector<2x128xf32>
    %243 = arith.addf %242, %241 : vector<2x128xf32>
    %244 = arith.divf %242, %243 : vector<2x128xf32>
    %245 = vector.extract_strided_slice %244 {offsets = [0, 0], sizes = [2, 32], strides = [1, 1]} : vector<2x128xf32> to vector<2x32xf32>
    %246 = vector.extract_strided_slice %244 {offsets = [0, 32], sizes = [2, 32], strides = [1, 1]} : vector<2x128xf32> to vector<2x32xf32>
    %247 = vector.extract_strided_slice %244 {offsets = [0, 64], sizes = [2, 32], strides = [1, 1]} : vector<2x128xf32> to vector<2x32xf32>
    %248 = vector.extract_strided_slice %244 {offsets = [0, 96], sizes = [2, 32], strides = [1, 1]} : vector<2x128xf32> to vector<2x32xf32>
    %cst_70 = arith.constant 2.000000e+00 : f32
    %249 = vector.broadcast %cst_70 : f32 to vector<2x32xf32>
    %250 = arith.mulf %249, %248 : vector<2x32xf32>
    %cst_71 = arith.constant 1.000000e+00 : f32
    %251 = vector.broadcast %cst_71 : f32 to vector<2x32xf32>
    %252 = arith.subf %250, %251 : vector<2x32xf32>
    %253 = arith.mulf %246, %207 : vector<2x32xf32>
    %254 = arith.mulf %245, %252 : vector<2x32xf32>
    %255 = arith.addf %253, %254 : vector<2x32xf32>
    %256 = math.tanh %255 : vector<2x32xf32>
    %257 = arith.mulf %247, %256 : vector<2x32xf32>
    %c5_i32 = arith.constant 5 : i32
    %258 = arith.truncf %257 : vector<2x32xf32> to vector<2x32xbf16>
    %cst_72 = arith.constant dense<0.000000e+00> : vector<2x128xf32>
    %259 = tpu.matmul %258, %13, %cst_72 {dimension_numbers = #tpu.dot_dimension_numbers<[1], [0], [0], [1], [0, 0, 1, 1], [], []>} : vector<2x32xbf16>, vector<32x128xbf16>, vector<2x128xf32> -> vector<2x128xf32>
    %260 = arith.addf %259, %16 : vector<2x128xf32>
    %261 = arith.index_cast %c5_i32 : i32 to index
    %c0_73 = arith.constant 0 : index
    %c0_74 = arith.constant 0 : index
    %262 = vector.load %arg10[%261, %c0_73, %c0_74] : memref<8x2x128xf32, #tpu.memory_space<vmem>>, vector<1x2x128xf32>
    %263 = vector.shape_cast %262 : vector<1x2x128xf32> to vector<2x128xf32>
    %264 = arith.truncf %236 : vector<2x32xf32> to vector<2x32xbf16>
    %cst_75 = arith.constant dense<0.000000e+00> : vector<2x128xf32>
    %265 = tpu.matmul %264, %11, %cst_75 {dimension_numbers = #tpu.dot_dimension_numbers<[1], [0], [0], [1], [0, 0, 1, 1], [], []>} : vector<2x32xbf16>, vector<32x128xbf16>, vector<2x128xf32> -> vector<2x128xf32>
    %266 = arith.addf %263, %265 : vector<2x128xf32>
    %267 = arith.negf %266 : vector<2x128xf32>
    %268 = math.exp %267 : vector<2x128xf32>
    %cst_76 = arith.constant 1.000000e+00 : f32
    %269 = vector.broadcast %cst_76 : f32 to vector<2x128xf32>
    %270 = arith.addf %269, %268 : vector<2x128xf32>
    %271 = arith.divf %269, %270 : vector<2x128xf32>
    %272 = vector.extract_strided_slice %271 {offsets = [0, 0], sizes = [2, 32], strides = [1, 1]} : vector<2x128xf32> to vector<2x32xf32>
    %273 = vector.extract_strided_slice %271 {offsets = [0, 32], sizes = [2, 32], strides = [1, 1]} : vector<2x128xf32> to vector<2x32xf32>
    %274 = vector.extract_strided_slice %271 {offsets = [0, 64], sizes = [2, 32], strides = [1, 1]} : vector<2x128xf32> to vector<2x32xf32>
    %275 = vector.extract_strided_slice %271 {offsets = [0, 96], sizes = [2, 32], strides = [1, 1]} : vector<2x128xf32> to vector<2x32xf32>
    %cst_77 = arith.constant 2.000000e+00 : f32
    %276 = vector.broadcast %cst_77 : f32 to vector<2x32xf32>
    %277 = arith.mulf %276, %275 : vector<2x32xf32>
    %cst_78 = arith.constant 1.000000e+00 : f32
    %278 = vector.broadcast %cst_78 : f32 to vector<2x32xf32>
    %279 = arith.subf %277, %278 : vector<2x32xf32>
    %280 = arith.mulf %273, %234 : vector<2x32xf32>
    %281 = arith.mulf %272, %279 : vector<2x32xf32>
    %282 = arith.addf %280, %281 : vector<2x32xf32>
    %283 = math.tanh %282 : vector<2x32xf32>
    %284 = arith.mulf %274, %283 : vector<2x32xf32>
    %285 = arith.truncf %284 : vector<2x32xf32> to vector<2x32xbf16>
    %cst_79 = arith.constant dense<0.000000e+00> : vector<2x128xf32>
    %286 = tpu.matmul %285, %12, %cst_79 {dimension_numbers = #tpu.dot_dimension_numbers<[1], [0], [0], [1], [0, 0, 1, 1], [], []>} : vector<2x32xbf16>, vector<32x128xbf16>, vector<2x128xf32> -> vector<2x128xf32>
    %287 = arith.addf %260, %286 : vector<2x128xf32>
    %288 = arith.negf %287 : vector<2x128xf32>
    %289 = math.exp %288 : vector<2x128xf32>
    %cst_80 = arith.constant 1.000000e+00 : f32
    %290 = vector.broadcast %cst_80 : f32 to vector<2x128xf32>
    %291 = arith.addf %290, %289 : vector<2x128xf32>
    %292 = arith.divf %290, %291 : vector<2x128xf32>
    %293 = vector.extract_strided_slice %292 {offsets = [0, 0], sizes = [2, 32], strides = [1, 1]} : vector<2x128xf32> to vector<2x32xf32>
    %294 = vector.extract_strided_slice %292 {offsets = [0, 32], sizes = [2, 32], strides = [1, 1]} : vector<2x128xf32> to vector<2x32xf32>
    %295 = vector.extract_strided_slice %292 {offsets = [0, 64], sizes = [2, 32], strides = [1, 1]} : vector<2x128xf32> to vector<2x32xf32>
    %296 = vector.extract_strided_slice %292 {offsets = [0, 96], sizes = [2, 32], strides = [1, 1]} : vector<2x128xf32> to vector<2x32xf32>
    %cst_81 = arith.constant 2.000000e+00 : f32
    %297 = vector.broadcast %cst_81 : f32 to vector<2x32xf32>
    %298 = arith.mulf %297, %296 : vector<2x32xf32>
    %cst_82 = arith.constant 1.000000e+00 : f32
    %299 = vector.broadcast %cst_82 : f32 to vector<2x32xf32>
    %300 = arith.subf %298, %299 : vector<2x32xf32>
    %301 = arith.mulf %294, %255 : vector<2x32xf32>
    %302 = arith.mulf %293, %300 : vector<2x32xf32>
    %303 = arith.addf %301, %302 : vector<2x32xf32>
    %304 = math.tanh %303 : vector<2x32xf32>
    %305 = arith.mulf %295, %304 : vector<2x32xf32>
    %c6_i32 = arith.constant 6 : i32
    %306 = arith.truncf %305 : vector<2x32xf32> to vector<2x32xbf16>
    %cst_83 = arith.constant dense<0.000000e+00> : vector<2x128xf32>
    %307 = tpu.matmul %306, %13, %cst_83 {dimension_numbers = #tpu.dot_dimension_numbers<[1], [0], [0], [1], [0, 0, 1, 1], [], []>} : vector<2x32xbf16>, vector<32x128xbf16>, vector<2x128xf32> -> vector<2x128xf32>
    %308 = arith.addf %307, %16 : vector<2x128xf32>
    %309 = arith.index_cast %c6_i32 : i32 to index
    %c0_84 = arith.constant 0 : index
    %c0_85 = arith.constant 0 : index
    %310 = vector.load %arg10[%309, %c0_84, %c0_85] : memref<8x2x128xf32, #tpu.memory_space<vmem>>, vector<1x2x128xf32>
    %311 = vector.shape_cast %310 : vector<1x2x128xf32> to vector<2x128xf32>
    %312 = arith.truncf %284 : vector<2x32xf32> to vector<2x32xbf16>
    %cst_86 = arith.constant dense<0.000000e+00> : vector<2x128xf32>
    %313 = tpu.matmul %312, %11, %cst_86 {dimension_numbers = #tpu.dot_dimension_numbers<[1], [0], [0], [1], [0, 0, 1, 1], [], []>} : vector<2x32xbf16>, vector<32x128xbf16>, vector<2x128xf32> -> vector<2x128xf32>
    %314 = arith.addf %311, %313 : vector<2x128xf32>
    %315 = arith.negf %314 : vector<2x128xf32>
    %316 = math.exp %315 : vector<2x128xf32>
    %cst_87 = arith.constant 1.000000e+00 : f32
    %317 = vector.broadcast %cst_87 : f32 to vector<2x128xf32>
    %318 = arith.addf %317, %316 : vector<2x128xf32>
    %319 = arith.divf %317, %318 : vector<2x128xf32>
    %320 = vector.extract_strided_slice %319 {offsets = [0, 0], sizes = [2, 32], strides = [1, 1]} : vector<2x128xf32> to vector<2x32xf32>
    %321 = vector.extract_strided_slice %319 {offsets = [0, 32], sizes = [2, 32], strides = [1, 1]} : vector<2x128xf32> to vector<2x32xf32>
    %322 = vector.extract_strided_slice %319 {offsets = [0, 64], sizes = [2, 32], strides = [1, 1]} : vector<2x128xf32> to vector<2x32xf32>
    %323 = vector.extract_strided_slice %319 {offsets = [0, 96], sizes = [2, 32], strides = [1, 1]} : vector<2x128xf32> to vector<2x32xf32>
    %cst_88 = arith.constant 2.000000e+00 : f32
    %324 = vector.broadcast %cst_88 : f32 to vector<2x32xf32>
    %325 = arith.mulf %324, %323 : vector<2x32xf32>
    %cst_89 = arith.constant 1.000000e+00 : f32
    %326 = vector.broadcast %cst_89 : f32 to vector<2x32xf32>
    %327 = arith.subf %325, %326 : vector<2x32xf32>
    %328 = arith.mulf %321, %282 : vector<2x32xf32>
    %329 = arith.mulf %320, %327 : vector<2x32xf32>
    %330 = arith.addf %328, %329 : vector<2x32xf32>
    %331 = math.tanh %330 : vector<2x32xf32>
    %332 = arith.mulf %322, %331 : vector<2x32xf32>
    %333 = arith.truncf %332 : vector<2x32xf32> to vector<2x32xbf16>
    %cst_90 = arith.constant dense<0.000000e+00> : vector<2x128xf32>
    %334 = tpu.matmul %333, %12, %cst_90 {dimension_numbers = #tpu.dot_dimension_numbers<[1], [0], [0], [1], [0, 0, 1, 1], [], []>} : vector<2x32xbf16>, vector<32x128xbf16>, vector<2x128xf32> -> vector<2x128xf32>
    %335 = arith.addf %308, %334 : vector<2x128xf32>
    %336 = arith.negf %335 : vector<2x128xf32>
    %337 = math.exp %336 : vector<2x128xf32>
    %cst_91 = arith.constant 1.000000e+00 : f32
    %338 = vector.broadcast %cst_91 : f32 to vector<2x128xf32>
    %339 = arith.addf %338, %337 : vector<2x128xf32>
    %340 = arith.divf %338, %339 : vector<2x128xf32>
    %341 = vector.extract_strided_slice %340 {offsets = [0, 0], sizes = [2, 32], strides = [1, 1]} : vector<2x128xf32> to vector<2x32xf32>
    %342 = vector.extract_strided_slice %340 {offsets = [0, 32], sizes = [2, 32], strides = [1, 1]} : vector<2x128xf32> to vector<2x32xf32>
    %343 = vector.extract_strided_slice %340 {offsets = [0, 64], sizes = [2, 32], strides = [1, 1]} : vector<2x128xf32> to vector<2x32xf32>
    %344 = vector.extract_strided_slice %340 {offsets = [0, 96], sizes = [2, 32], strides = [1, 1]} : vector<2x128xf32> to vector<2x32xf32>
    %cst_92 = arith.constant 2.000000e+00 : f32
    %345 = vector.broadcast %cst_92 : f32 to vector<2x32xf32>
    %346 = arith.mulf %345, %344 : vector<2x32xf32>
    %cst_93 = arith.constant 1.000000e+00 : f32
    %347 = vector.broadcast %cst_93 : f32 to vector<2x32xf32>
    %348 = arith.subf %346, %347 : vector<2x32xf32>
    %349 = arith.mulf %342, %303 : vector<2x32xf32>
    %350 = arith.mulf %341, %348 : vector<2x32xf32>
    %351 = arith.addf %349, %350 : vector<2x32xf32>
    %352 = math.tanh %351 : vector<2x32xf32>
    %353 = arith.mulf %343, %352 : vector<2x32xf32>
    %c7_i32 = arith.constant 7 : i32
    %354 = arith.truncf %353 : vector<2x32xf32> to vector<2x32xbf16>
    %cst_94 = arith.constant dense<0.000000e+00> : vector<2x128xf32>
    %355 = tpu.matmul %354, %13, %cst_94 {dimension_numbers = #tpu.dot_dimension_numbers<[1], [0], [0], [1], [0, 0, 1, 1], [], []>} : vector<2x32xbf16>, vector<32x128xbf16>, vector<2x128xf32> -> vector<2x128xf32>
    %356 = arith.addf %355, %16 : vector<2x128xf32>
    %357 = arith.index_cast %c7_i32 : i32 to index
    %c0_95 = arith.constant 0 : index
    %c0_96 = arith.constant 0 : index
    %358 = vector.load %arg10[%357, %c0_95, %c0_96] : memref<8x2x128xf32, #tpu.memory_space<vmem>>, vector<1x2x128xf32>
    %359 = vector.shape_cast %358 : vector<1x2x128xf32> to vector<2x128xf32>
    %360 = arith.truncf %332 : vector<2x32xf32> to vector<2x32xbf16>
    %cst_97 = arith.constant dense<0.000000e+00> : vector<2x128xf32>
    %361 = tpu.matmul %360, %11, %cst_97 {dimension_numbers = #tpu.dot_dimension_numbers<[1], [0], [0], [1], [0, 0, 1, 1], [], []>} : vector<2x32xbf16>, vector<32x128xbf16>, vector<2x128xf32> -> vector<2x128xf32>
    %362 = arith.addf %359, %361 : vector<2x128xf32>
    %363 = arith.negf %362 : vector<2x128xf32>
    %364 = math.exp %363 : vector<2x128xf32>
    %cst_98 = arith.constant 1.000000e+00 : f32
    %365 = vector.broadcast %cst_98 : f32 to vector<2x128xf32>
    %366 = arith.addf %365, %364 : vector<2x128xf32>
    %367 = arith.divf %365, %366 : vector<2x128xf32>
    %368 = vector.extract_strided_slice %367 {offsets = [0, 0], sizes = [2, 32], strides = [1, 1]} : vector<2x128xf32> to vector<2x32xf32>
    %369 = vector.extract_strided_slice %367 {offsets = [0, 32], sizes = [2, 32], strides = [1, 1]} : vector<2x128xf32> to vector<2x32xf32>
    %370 = vector.extract_strided_slice %367 {offsets = [0, 64], sizes = [2, 32], strides = [1, 1]} : vector<2x128xf32> to vector<2x32xf32>
    %371 = vector.extract_strided_slice %367 {offsets = [0, 96], sizes = [2, 32], strides = [1, 1]} : vector<2x128xf32> to vector<2x32xf32>
    %cst_99 = arith.constant 2.000000e+00 : f32
    %372 = vector.broadcast %cst_99 : f32 to vector<2x32xf32>
    %373 = arith.mulf %372, %371 : vector<2x32xf32>
    %cst_100 = arith.constant 1.000000e+00 : f32
    %374 = vector.broadcast %cst_100 : f32 to vector<2x32xf32>
    %375 = arith.subf %373, %374 : vector<2x32xf32>
    %376 = arith.mulf %369, %330 : vector<2x32xf32>
    %377 = arith.mulf %368, %375 : vector<2x32xf32>
    %378 = arith.addf %376, %377 : vector<2x32xf32>
    %379 = math.tanh %378 : vector<2x32xf32>
    %380 = arith.mulf %370, %379 : vector<2x32xf32>
    %381 = arith.truncf %380 : vector<2x32xf32> to vector<2x32xbf16>
    %cst_101 = arith.constant dense<0.000000e+00> : vector<2x128xf32>
    %382 = tpu.matmul %381, %12, %cst_101 {dimension_numbers = #tpu.dot_dimension_numbers<[1], [0], [0], [1], [0, 0, 1, 1], [], []>} : vector<2x32xbf16>, vector<32x128xbf16>, vector<2x128xf32> -> vector<2x128xf32>
    %383 = arith.addf %356, %382 : vector<2x128xf32>
    %384 = arith.negf %383 : vector<2x128xf32>
    %385 = math.exp %384 : vector<2x128xf32>
    %cst_102 = arith.constant 1.000000e+00 : f32
    %386 = vector.broadcast %cst_102 : f32 to vector<2x128xf32>
    %387 = arith.addf %386, %385 : vector<2x128xf32>
    %388 = arith.divf %386, %387 : vector<2x128xf32>
    %389 = vector.extract_strided_slice %388 {offsets = [0, 0], sizes = [2, 32], strides = [1, 1]} : vector<2x128xf32> to vector<2x32xf32>
    %390 = vector.extract_strided_slice %388 {offsets = [0, 32], sizes = [2, 32], strides = [1, 1]} : vector<2x128xf32> to vector<2x32xf32>
    %391 = vector.extract_strided_slice %388 {offsets = [0, 64], sizes = [2, 32], strides = [1, 1]} : vector<2x128xf32> to vector<2x32xf32>
    %392 = vector.extract_strided_slice %388 {offsets = [0, 96], sizes = [2, 32], strides = [1, 1]} : vector<2x128xf32> to vector<2x32xf32>
    %cst_103 = arith.constant 2.000000e+00 : f32
    %393 = vector.broadcast %cst_103 : f32 to vector<2x32xf32>
    %394 = arith.mulf %393, %392 : vector<2x32xf32>
    %cst_104 = arith.constant 1.000000e+00 : f32
    %395 = vector.broadcast %cst_104 : f32 to vector<2x32xf32>
    %396 = arith.subf %394, %395 : vector<2x32xf32>
    %397 = arith.mulf %390, %351 : vector<2x32xf32>
    %398 = arith.mulf %389, %396 : vector<2x32xf32>
    %399 = arith.addf %397, %398 : vector<2x32xf32>
    %400 = math.tanh %399 : vector<2x32xf32>
    %401 = arith.mulf %391, %400 : vector<2x32xf32>
    %c8_i32 = arith.constant 8 : i32
    %402 = arith.truncf %401 : vector<2x32xf32> to vector<2x32xbf16>
    %c0_105 = arith.constant 0 : index
    %c0_106 = arith.constant 0 : index
    %403 = vector.load %arg7[%c0_105, %c0_106] : memref<32x1xbf16, #tpu.memory_space<vmem>>, vector<32x1xbf16>
    %cst_107 = arith.constant dense<0.000000e+00> : vector<2x1xf32>
    %404 = tpu.matmul %402, %403, %cst_107 {dimension_numbers = #tpu.dot_dimension_numbers<[1], [0], [0], [1], [0, 0, 1, 1], [], []>} : vector<2x32xbf16>, vector<32x1xbf16>, vector<2x1xf32> -> vector<2x1xf32>
    %c0_108 = arith.constant 0 : index
    %c0_109 = arith.constant 0 : index
    %405 = vector.load %arg8[%c0_108, %c0_109] : memref<1x1xf32, #tpu.memory_space<vmem>>, vector<1x1xf32>
    %406 = vector.broadcast %405 : vector<1x1xf32> to vector<2x1xf32>
    %407 = arith.addf %404, %406 : vector<2x1xf32>
    %c0_110 = arith.constant 0 : index
    %c0_111 = arith.constant 0 : index
    %408 = vector.load %arg9[%c0_110, %c0_111] : memref<2x1xf32, #tpu.memory_space<vmem>>, vector<2x1xf32>
    tpu.vector_store %arg9[%c0_110, %c0_111], %407 {strides = array<i32>} : memref<2x1xf32, #tpu.memory_space<vmem>>, vector<2x1xf32>,
    return
  }
}

</mosaic_0001>

<bundles_post_ra>
// kernel: tpu_custom_call.1
= control target key start
LH: loop header
LB: loop body
LE: loop exit
PB: predicated region body
PF: predicated region fallthrough
CT: control target
= control target key end

     0   :  { %v2252_v0 = vmov 0.0   ;;  %vm2253_vm0 = vmmov 0   ;;  %v2254_v2 = vmov 0   ;;  %s2255_s19 = smov 32   ;;  %s2256_s29 = smov 64   ;;  %vm152_vm1 = vcmask 261120   ;;  %s2713_s3 = inlined_call_operand.vmem [shape: bf16[32,128], index: 3, kind: input, shape index: {}]   ;;  %s2714_s0 = inlined_call_operand.vmem [shape: f32[8,2,1], index: 0, kind: input, shape index: {}]   ;;  %s2715_s1 = inlined_call_operand.vmem [shape: f32[1,128], index: 1, kind: input, shape index: {}]   ;;  %s2716_s2 = inlined_call_operand.vmem [shape: f32[1,128], index: 2, kind: input, shape index: {}]   ;;  %s2717_s5 = inlined_call_operand.vmem [shape: bf16[32,128], index: 5, kind: input, shape index: {}]   ;;  %s2718_s4 = inlined_call_operand.vmem [shape: bf16[32,128], index: 4, kind: input, shape index: {}]   ;;  %s2719_s6 = inlined_call_operand.vmem [shape: f32[1,128], index: 6, kind: input, shape index: {}]   ;;  %s2720_s7 = inlined_call_operand.vmem [shape: bf16[32,1], index: 7, kind: input, shape index: {}]   ;;  %s2721_s8 = inlined_call_operand.<no memory space> [shape: f32[1,1], index: 8, kind: input, shape index: {}]   ;;  %s2722_s9 = inlined_call_operand.vmem [shape: f32[2,1], index: 9, kind: output, shape index: {}]  }
   0x1   :  { %1902 = vmatprep.subr.bf16.mxu1 %v2252_v0  ;;  %v2311_v1 = vld [vmem:[%s2713_s3] sm:$0xff]   ;;  %1906 = vmatprep.mubr.msk.bf16.mxu1 %vm2253_vm0, %v2252_v0  ;;  %v2320_v3 = vld [vmem:[%s2713_s3 + $0x8] sm:$0xff]   ;;  %vm1746_vm2 = vcmask 1024  }
   0x2   :  { %2139 = vset.pattern.permute.xlu0 %v2254_v2  ;;  %1894 = vmatprep.subr.bf16.mxu0 %v2252_v0  ;;  %v35_v4 = vld [vmem:[%s2714_s0] sm:$0x3]  ;;  %v2358_v28 = vld [vmem:[%s2717_s5 + $0x8] sm:$0xff]   ;;  %v36_v33 = vld [vmem:[%s2714_s0 + $0x2] sm:$0x3] }
   0x3   :  { %1903 = vmatpush3.bf16.msra.mxu1 %v2311_v1  ;;  %1898 = vmatprep.mubr.msk.bf16.mxu0 %vm2253_vm0, %v2252_v0  ;;  %v2335_v5 = vld [vmem:[%s2715_s1] ss:$0 sm:$0xff]  ;;  %v2377_v31 = vld [vmem:[%s2718_s4 + $0x8] sm:$0xff]  }
   0x4   :  { %1904 = vmatprep.subr.bf16.mxu1 %v2252_v0  ;;  %46 = vperm.xlu0 %2139, %v35_v4   ;;  %v2340_v6 = vld [vmem:[%s2716_s2] ss:$0 sm:$0xff] }
   0x5   :  { %2140 = vset.pattern.permute.xlu1 %v2254_v2  ;;  %v2352_v27 = vld [vmem:[%s2717_s5] sm:$0xff]  }
   0x6   :  { %1895 = vmatpush3.bf16.msra.mxu0 %v2352_v27  ;;  %v2367_v29 = vld [vmem:[%s2718_s4] sm:$0xff]  }
   0x7   :  { %1905 = vmatpush3.bf16.msra.mxu1 %v2320_v3  ;;  %1896 = vmatprep.subr.bf16.mxu0 %v2252_v0  ;;  %v2407_v40 = vld [vmem:[%s2719_s6] ss:$0 sm:$0xff] }
   0x8   :  { %1918 = vmatprep.subr.bf16.mxu1 %v2252_v0 }
   0xa   :  { %1907 = vmatmul.mubr.bf16.vlgmr.msra.gmra.mrb[0].mxu1 %v2254_v2  ;;  %1897 = vmatpush3.bf16.msra.mxu0 %v2358_v28 }
   0xb   :  { %1922 = vmatprep.mubr.msk.bf16.mxu1 %vm2253_vm0, %v2252_v0  ;;  %1919 = vmatpush3.bf16.msra.mxu1 %v2352_v27 }
   0xc   :  { %1920 = vmatprep.subr.bf16.mxu1 %v2252_v0  ;;  %1910 = vmatprep.subr.bf16.mxu0 %v2252_v0 }
   0xd   :  { %1899 = vmatmul.mubr.bf16.vlgmr.msra.gmra.mrb[0].mxu0 %v2254_v2 }
   0xe   :  { %1911 = vmatpush3.bf16.msra.mxu0 %v2367_v29  ;;  %1914 = vmatprep.mubr.msk.bf16.mxu0 %vm2253_vm0, %v2252_v0 }
   0xf   :  { %1921 = vmatpush3.bf16.msra.mxu1 %v2358_v28  ;;  %1912 = vmatprep.subr.bf16.mxu0 %v2252_v0 }
  0x10   :  { %1934 = vmatprep.subr.bf16.mxu1 %v2252_v0 }
  0x12   :  { %1913 = vmatpush3.bf16.msra.mxu0 %v2377_v31 }
  0x13   :  { %1926 = vmatprep.subr.bf16.mxu0 %v2252_v0 }
  0x83   :  { %v47_v7 = vpop.permute.xlu0 %46 }
  0x84   :  { %v90_v8 = vmul.f32 %v2335_v5, %v47_v7 }
  0x86   :  { %v105_v9 = vadd.f32 %v2340_v6, %v90_v8 }
  0x88   :  { %113 = vst [vmem:[#allocation2] sm:$0x3] %v105_v9 }
  0x8f   :  { %v196_v10 = vld [vmem:[#allocation2] sm:$0x3] }
  0xdd   :  { %v243_v11 = vpop.f32.mrb[0].mxu1 }
  0xde   :  { %v249_v12 = vadd.f32 %v243_v11, %v196_v10  ;;  %v1908_v13 = vpop.f32.mrb[1].mxu1 }
  0xdf   :  { %v246_v14 = vpop.f32.mrb[2].mxu1 }
  0xe0   :  { %v1759_v15 = vmul.f32 -1.442695, %v249_v12  ;;  %v1909_v16 = vpop.f32.mrb[3].mxu1 }
  0xe2   :  { %2149 = vpow2.f32 %v1759_v15 }
  0xec   :  { %v2150_v17 = vpop.eup %2149 }
  0xed   :  { %v253_v18 = vadd.f32 1.0, %v2150_v17 }
  0xef   :  { %2151 = vrcp.f32 %v253_v18 }
  0xf9   :  { %v2152_v19 = vpop.eup %2151 }
  0xfa   :  { %v256_v20 = vmul.f32 2.0, %v2152_v19  ;;  %v258_v24 = vmul.f32 0.0, %v2152_v19 }
  0xfc   :  { %v1760_v21 = vadd.f32 -1.0, %v256_v20  ;;  %v37_v20 = vld [vmem:[%s2714_s0 + $0x4] sm:$0x3] }
  0xfe   :  { %260 = vrot.lane.b32.xlu0 %v1760_v21, %s2255_s19 }
 0x170   :  { %v261_v22 = vpop.permute.xlu0 %260 }
 0x171   :  { %v263_v23 = vmul.f32 %v2152_v19, %v261_v22 }
 0x173   :  { %265 = vrot.lane.b32.xlu1 %v263_v23, %s2255_s19 }
 0x1e5   :  { %v266_v25 = vpop.permute.xlu1 %265 }
 0x1e6   :  { %v2346_v26 = vadd.f32 %v266_v25, %v258_v24 }
 0x1e8   :  { %2153 = vtanh.f32 %v2346_v26 }
 0x1f2   :  { %v2154_v30 = vpop.eup %2153 }
 0x1f3   :  { %271 = vrot.lane.b32.xlu1 %v2154_v30, %s2255_s19 }
 0x1f7   :  { %51 = vperm.xlu1 %2140, %v36_v33  }
 0x265   :  { %v272_v32 = vpop.permute.xlu1 %271 }
 0x266   :  { %v274_v34 = vmul.f32 %v2152_v19, %v272_v32 }
 0x268   :  { %v275_v35 = vpack.c.bf16 %v274_v34, %v274_v34 }
 0x26a   :  { %277 = vrot.lane.b32.xlu0 %v275_v35, %s2256_s29 }
 0x276   :  { %v52_v37 = vpop.permute.xlu1 %51 }
 0x277   :  { %v91_v38 = vmul.f32 %v2335_v5, %v52_v37 }
 0x279   :  { %v106_v39 = vadd.f32 %v2340_v6, %v91_v38 }
 0x27b   :  { %114 = vst [vmem:[#allocation2 + $0x2] sm:$0x3] %v106_v39 }
 0x282   :  { %v408_v47 = vld [vmem:[#allocation2 + $0x2] sm:$0x3] }
 0x2dc   :  { %v278_v36 = vpop.permute.xlu0 %277 }
 0x2dd   :  { %1915 = vmatmul.mubr.msk.bf16.vlgmr.msra.gmra.mrb[0].mxu0 %vm152_vm1, %v278_v36 }
 0x2de   :  { %1927 = vmatpush3.bf16.msra.mxu0 %v2311_v1  ;;  %1930 = vmatprep.mubr.msk.bf16.mxu0 %vm2253_vm0, %v2252_v0 }
 0x2df   :  { %1928 = vmatprep.subr.bf16.mxu0 %v2252_v0 }
 0x2e2   :  { %1929 = vmatpush3.bf16.msra.mxu0 %v2320_v3 }
 0x2e3   :  { %1942 = vmatprep.subr.bf16.mxu0 %v2252_v0 }
 0x2e5   :  { %1931 = vmatmul.mubr.msk.bf16.vlgmr.msra.gmra.mrb[4].mxu0 %vm152_vm1, %v278_v36 }
 0x2e6   :  { %1943 = vmatpush3.bf16.msra.mxu0 %v2352_v27  ;;  %1946 = vmatprep.mubr.msk.bf16.mxu0 %vm2253_vm0, %v2252_v0 }
 0x2e7   :  { %1944 = vmatprep.subr.bf16.mxu0 %v2252_v0 }
 0x2ea   :  { %1945 = vmatpush3.bf16.msra.mxu0 %v2358_v28 }
 0x2eb   :  { %1958 = vmatprep.subr.bf16.mxu0 %v2252_v0 }
 0x3b0   :  { %v328_v41 = vpop.f32.mrb[0].mxu0 }
 0x3b1   :  { %v2094_v42 = vadd.f32 %v2407_v40, %v328_v41  ;;  %v1916_v43 = vpop.f32.mrb[1].mxu0 }
 0x3b2   :  { %v331_v44 = vpop.f32.mrb[2].mxu0 }
 0x3b3   :  { %v1764_v45 = vmul.f32 -1.442695, %v2094_v42  ;;  %v1917_v46 = vpop.f32.mrb[3].mxu0 }
 0x3b5   :  { %2155 = vpow2.f32 %v1764_v45 }
 0x3b8   :  { %v443_v48 = vpop.f32.mrb[4].mxu0 }
 0x3b9   :  { %v449_v49 = vadd.f32 %v443_v48, %v408_v47  ;;  %v1932_v50 = vpop.f32.mrb[5].mxu0 }
 0x3ba   :  { %v446_v51 = vpop.f32.mrb[6].mxu0 }
 0x3bb   :  { %v1768_v52 = vmul.f32 -1.442695, %v449_v49  ;;  %v1933_v53 = vpop.f32.mrb[7].mxu0 }
 0x3bd   :  { %2157 = vpow2.f32 %v1768_v52 }
 0x3bf   :  { %v2156_v54 = vpop.eup %2155 }
 0x3c0   :  { %v338_v55 = vadd.f32 1.0, %v2156_v54 }
 0x3c2   :  { %2159 = vrcp.f32 %v338_v55 }
 0x3c7   :  { %v2158_v56 = vpop.eup %2157 }
 0x3c8   :  { %v453_v57 = vadd.f32 1.0, %v2158_v56 }
 0x3ca   :  { %2161 = vrcp.f32 %v453_v57 }
 0x3cc   :  { %v2160_v58 = vpop.eup %2159 }
 0x3cd   :  { %v341_v59 = vmul.f32 2.0, %v2160_v58  ;;  %v343_v9 = vmul.f32 0.0, %v2160_v58 }
 0x3cf   :  { %v1765_v60 = vadd.f32 -1.0, %v341_v59 }
 0x3d1   :  { %345 = vrot.lane.b32.xlu0 %v1765_v60, %s2255_s19 }
 0x3d4   :  { %v2162_v61 = vpop.eup %2161 }
 0x3d5   :  { %v456_v62 = vmul.f32 2.0, %v2162_v61  ;;  %v458_v12 = vmul.f32 %v2162_v61, %v2346_v26 }
 0x3d7   :  { %v1769_v63 = vadd.f32 -1.0, %v456_v62 }
 0x3d9   :  { %460 = vrot.lane.b32.xlu1 %v1769_v63, %s2255_s19 }
 0x443   :  { %v346_v2 = vpop.permute.xlu0 %345 }
 0x444   :  { %v348_v4 = vmul.f32 %v2160_v58, %v346_v2 }
 0x446   :  { %350 = vrot.lane.b32.xlu0 %v348_v4, %s2255_s19 }
 0x44b   :  { %v461_v7 = vpop.permute.xlu1 %460 }
 0x44c   :  { %v463_v8 = vmul.f32 %v2162_v61, %v461_v7 }
 0x44e   :  { %465 = vrot.lane.b32.xlu1 %v463_v8, %s2255_s19 }
 0x4b8   :  { %v351_v10 = vpop.permute.xlu0 %350 }
 0x4b9   :  { %v2414_v11 = vadd.f32 %v351_v10, %v343_v9 }
 0x4bb   :  { %2163 = vtanh.f32 %v2414_v11 }
 0x4c0   :  { %v466_v13 = vpop.permute.xlu1 %465 }
 0x4c1   :  { %v2418_v14 = vadd.f32 %v466_v13, %v458_v12  ;;  %v38_v13 = vld [vmem:[%s2714_s0 + $0x6] sm:$0x3] }
 0x4c3   :  { %2165 = vtanh.f32 %v2418_v14 }
 0x4c5   :  { %v2164_v15 = vpop.eup %2163 }
 0x4c6   :  { %356 = vrot.lane.b32.xlu0 %v2164_v15, %s2255_s19 }
 0x4cd   :  { %v2166_v16 = vpop.eup %2165 }
 0x4ce   :  { %471 = vrot.lane.b32.xlu1 %v2166_v16, %s2255_s19 }
 0x538   :  { %v357_v17 = vpop.permute.xlu0 %356 }
 0x539   :  { %v359_v18 = vmul.f32 %v2160_v58, %v357_v17 }
 0x53b   :  { %v360_v19 = vpack.c.bf16 %v359_v18, %v359_v18 }
 0x53d   :  { %362 = vrot.lane.b32.xlu0 %v360_v19, %s2256_s29 }
 0x540   :  { %v472_v21 = vpop.permute.xlu1 %471 }
 0x541   :  { %v474_v22 = vmul.f32 %v2162_v61, %v472_v21  ;;  %56 = vperm.xlu0 %2139, %v37_v20  }
 0x543   :  { %v475_v23 = vpack.c.bf16 %v474_v22, %v474_v22 }
 0x545   :  { %477 = vrot.lane.b32.xlu1 %v475_v23, %s2256_s29 }
 0x5af   :  { %v363_v24 = vpop.permute.xlu0 %362 }
 0x5b0   :  { %1923 = vmatmul.mubr.msk.bf16.vlgmr.msra.gmra.mrb[4].mxu1 %vm152_vm1, %v363_v24 }
 0x5b1   :  { %1935 = vmatpush3.bf16.msra.mxu1 %v2367_v29  ;;  %1938 = vmatprep.mubr.msk.bf16.mxu1 %vm2253_vm0, %v2252_v0 }
 0x5b2   :  { %1936 = vmatprep.subr.bf16.mxu1 %v2252_v0 }
 0x5b5   :  { %1937 = vmatpush3.bf16.msra.mxu1 %v2377_v31 }
 0x5b6   :  { %1950 = vmatprep.subr.bf16.mxu1 %v2252_v0 }
 0x5b7   :  { %v478_v25 = vpop.permute.xlu1 %477 }
 0x5bc   :  { %1939 = vmatmul.mubr.msk.bf16.vlgmr.msra.gmra.mrb[4].mxu1 %vm152_vm1, %v478_v25 }
 0x5bd   :  { %1951 = vmatpush3.bf16.msra.mxu1 %v2311_v1  ;;  %1954 = vmatprep.mubr.msk.bf16.mxu1 %vm2253_vm0, %v2252_v0 }
 0x5be   :  { %1952 = vmatprep.subr.bf16.mxu1 %v2252_v0 }
 0x5c0   :  { %v57_v26 = vpop.permute.xlu0 %56 }
 0x5c1   :  { %v92_v30 = vmul.f32 %v2335_v5, %v57_v26  ;;  %1953 = vmatpush3.bf16.msra.mxu1 %v2320_v3 }
 0x5c2   :  { %1966 = vmatprep.subr.bf16.mxu1 %v2252_v0 }
 0x5c3   :  { %v107_v32 = vadd.f32 %v2340_v6, %v92_v30 }
 0x5c4   :  { %1955 = vmatmul.mubr.msk.bf16.vlgmr.msra.gmra.mrb[8].mxu1 %vm152_vm1, %v478_v25 }
 0x5c5   :  { %115 = vst [vmem:[#allocation2 + $0x4] sm:$0x3] %v107_v32  ;;  %1967 = vmatpush3.bf16.msra.mxu1 %v2352_v27  ;;  %1970 = vmatprep.mubr.msk.bf16.mxu1 %vm2253_vm0, %v2252_v0 }
 0x5c6   :  { %1968 = vmatprep.subr.bf16.mxu1 %v2252_v0 }
 0x5c9   :  { %1969 = vmatpush3.bf16.msra.mxu1 %v2358_v28 }
 0x5ca   :  { %1982 = vmatprep.subr.bf16.mxu1 %v2252_v0 }
 0x5cc   :  { %v596_v39 = vld [vmem:[#allocation2 + $0x4] sm:$0x3] }
 0x68f   :  { %v516_v33 = vpop.f32.mrb[4].mxu1 }
 0x690   :  { %v2095_v34 = vadd.f32 %v2407_v40, %v516_v33  ;;  %v1940_v35 = vpop.f32.mrb[5].mxu1 }
 0x691   :  { %v519_v36 = vpop.f32.mrb[6].mxu1 }
 0x692   :  { %v1771_v37 = vmul.f32 -1.442695, %v2095_v34  ;;  %v1941_v38 = vpop.f32.mrb[7].mxu1 }
 0x694   :  { %2167 = vpow2.f32 %v1771_v37 }
 0x697   :  { %v631_v41 = vpop.f32.mrb[8].mxu1 }
 0x698   :  { %v637_v42 = vadd.f32 %v631_v41, %v596_v39  ;;  %v1956_v43 = vpop.f32.mrb[9].mxu1 }
 0x699   :  { %v634_v44 = vpop.f32.mrb[10].mxu1 }
 0x69a   :  { %v1775_v45 = vmul.f32 -1.442695, %v637_v42  ;;  %v1957_v46 = vpop.f32.mrb[11].mxu1 }
 0x69c   :  { %2169 = vpow2.f32 %v1775_v45 }
 0x69e   :  { %v2168_v47 = vpop.eup %2167 }
 0x69f   :  { %v526_v48 = vadd.f32 1.0, %v2168_v47 }
 0x6a1   :  { %2171 = vrcp.f32 %v526_v48 }
 0x6a6   :  { %v2170_v49 = vpop.eup %2169 }
 0x6a7   :  { %v641_v50 = vadd.f32 1.0, %v2170_v49 }
 0x6a9   :  { %2173 = vrcp.f32 %v641_v50 }
 0x6ab   :  { %v2172_v51 = vpop.eup %2171 }
 0x6ac   :  { %v529_v52 = vmul.f32 2.0, %v2172_v51  ;;  %v531_v61 = vmul.f32 %v2172_v51, %v2414_v11 }
 0x6ae   :  { %v1772_v53 = vadd.f32 -1.0, %v529_v52 }
 0x6b0   :  { %533 = vrot.lane.b32.xlu1 %v1772_v53, %s2255_s19 }
 0x6b3   :  { %v2174_v54 = vpop.eup %2173 }
 0x6b4   :  { %v644_v55 = vmul.f32 2.0, %v2174_v54  ;;  %v646_v2 = vmul.f32 %v2174_v54, %v2418_v14 }
 0x6b6   :  { %v1776_v56 = vadd.f32 -1.0, %v644_v55 }
 0x6b8   :  { %648 = vrot.lane.b32.xlu0 %v1776_v56, %s2255_s19 }
 0x722   :  { %v534_v57 = vpop.permute.xlu1 %533 }
 0x723   :  { %v536_v58 = vmul.f32 %v2172_v51, %v534_v57 }
 0x725   :  { %538 = vrot.lane.b32.xlu1 %v536_v58, %s2255_s19 }
 0x72a   :  { %v649_v59 = vpop.permute.xlu0 %648 }
 0x72b   :  { %v651_v60 = vmul.f32 %v2174_v54, %v649_v59 }
 0x72d   :  { %653 = vrot.lane.b32.xlu0 %v651_v60, %s2255_s19 }
 0x797   :  { %v539_v62 = vpop.permute.xlu1 %538 }
 0x798   :  { %v2457_v63 = vadd.f32 %v539_v62, %v531_v61 }
 0x79a   :  { %2175 = vtanh.f32 %v2457_v63 }
 0x79f   :  { %v654_v4 = vpop.permute.xlu0 %653 }
 0x7a0   :  { %v2461_v7 = vadd.f32 %v654_v4, %v646_v2  ;;  %v39_v4 = vld [vmem:[%s2714_s0 + $0x8] sm:$0x3] }
 0x7a2   :  { %2177 = vtanh.f32 %v2461_v7 }
 0x7a4   :  { %v2176_v8 = vpop.eup %2175 }
 0x7a5   :  { %544 = vrot.lane.b32.xlu1 %v2176_v8, %s2255_s19 }
 0x7ac   :  { %v2178_v9 = vpop.eup %2177 }
 0x7ad   :  { %659 = vrot.lane.b32.xlu0 %v2178_v9, %s2255_s19 }
 0x817   :  { %v545_v10 = vpop.permute.xlu1 %544 }
 0x818   :  { %v547_v11 = vmul.f32 %v2172_v51, %v545_v10 }
 0x81a   :  { %v548_v12 = vpack.c.bf16 %v547_v11, %v547_v11 }
 0x81c   :  { %550 = vrot.lane.b32.xlu1 %v548_v12, %s2256_s29 }
 0x81f   :  { %v660_v14 = vpop.permute.xlu0 %659 }
 0x820   :  { %v662_v15 = vmul.f32 %v2174_v54, %v660_v14  ;;  %61 = vperm.xlu1 %2140, %v38_v13  }
 0x822   :  { %v663_v16 = vpack.c.bf16 %v662_v15, %v662_v15 }
 0x824   :  { %665 = vrot.lane.b32.xlu0 %v663_v16, %s2256_s29 }
 0x88e   :  { %v551_v17 = vpop.permute.xlu1 %550 }
 0x88f   :  { %1947 = vmatmul.mubr.msk.bf16.vlgmr.msra.gmra.mrb[8].mxu0 %vm152_vm1, %v551_v17 }
 0x890   :  { %1959 = vmatpush3.bf16.msra.mxu0 %v2367_v29  ;;  %1962 = vmatprep.mubr.msk.bf16.mxu0 %vm2253_vm0, %v2252_v0 }
 0x891   :  { %1960 = vmatprep.subr.bf16.mxu0 %v2252_v0 }
 0x894   :  { %1961 = vmatpush3.bf16.msra.mxu0 %v2377_v31 }
 0x895   :  { %1974 = vmatprep.subr.bf16.mxu0 %v2252_v0 }
 0x896   :  { %v666_v18 = vpop.permute.xlu0 %665 }
 0x89b   :  { %1963 = vmatmul.mubr.msk.bf16.vlgmr.msra.gmra.mrb[8].mxu0 %vm152_vm1, %v666_v18 }
 0x89c   :  { %1975 = vmatpush3.bf16.msra.mxu0 %v2311_v1  ;;  %1978 = vmatprep.mubr.msk.bf16.mxu0 %vm2253_vm0, %v2252_v0 }
 0x89d   :  { %1976 = vmatprep.subr.bf16.mxu0 %v2252_v0 }
 0x89f   :  { %v62_v19 = vpop.permute.xlu1 %61 }
 0x8a0   :  { %v93_v20 = vmul.f32 %v2335_v5, %v62_v19  ;;  %1977 = vmatpush3.bf16.msra.mxu0 %v2320_v3 }
 0x8a1   :  { %1990 = vmatprep.subr.bf16.mxu0 %v2252_v0 }
 0x8a2   :  { %v108_v21 = vadd.f32 %v2340_v6, %v93_v20 }
 0x8a3   :  { %1979 = vmatmul.mubr.msk.bf16.vlgmr.msra.gmra.mrb[12].mxu0 %vm152_vm1, %v666_v18 }
 0x8a4   :  { %116 = vst [vmem:[#allocation2 + $0x6] sm:$0x3] %v108_v21  ;;  %1991 = vmatpush3.bf16.msra.mxu0 %v2352_v27  ;;  %1994 = vmatprep.mubr.msk.bf16.mxu0 %vm2253_vm0, %v2252_v0 }
 0x8a5   :  { %1992 = vmatprep.subr.bf16.mxu0 %v2252_v0 }
 0x8a8   :  { %1993 = vmatpush3.bf16.msra.mxu0 %v2358_v28 }
 0x8a9   :  { %2006 = vmatprep.subr.bf16.mxu0 %v2252_v0 }
 0x8ab   :  { %v784_v32 = vld [vmem:[#allocation2 + $0x6] sm:$0x3] }
 0x96e   :  { %v704_v22 = vpop.f32.mrb[8].mxu0 }
 0x96f   :  { %v2096_v23 = vadd.f32 %v2407_v40, %v704_v22  ;;  %v1964_v24 = vpop.f32.mrb[9].mxu0 }
 0x970   :  { %v707_v25 = vpop.f32.mrb[10].mxu0 }
 0x971   :  { %v1778_v26 = vmul.f32 -1.442695, %v2096_v23  ;;  %v1965_v30 = vpop.f32.mrb[11].mxu0 }
 0x973   :  { %2179 = vpow2.f32 %v1778_v26 }
 0x976   :  { %v819_v33 = vpop.f32.mrb[12].mxu0 }
 0x977   :  { %v825_v34 = vadd.f32 %v819_v33, %v784_v32  ;;  %v1980_v35 = vpop.f32.mrb[13].mxu0 }
 0x978   :  { %v822_v36 = vpop.f32.mrb[14].mxu0 }
 0x979   :  { %v1782_v37 = vmul.f32 -1.442695, %v825_v34  ;;  %v1981_v38 = vpop.f32.mrb[15].mxu0 }
 0x97b   :  { %2181 = vpow2.f32 %v1782_v37 }
 0x97d   :  { %v2180_v39 = vpop.eup %2179 }
 0x97e   :  { %v714_v41 = vadd.f32 1.0, %v2180_v39 }
 0x980   :  { %2183 = vrcp.f32 %v714_v41 }
 0x985   :  { %v2182_v42 = vpop.eup %2181 }
 0x986   :  { %v829_v43 = vadd.f32 1.0, %v2182_v42 }
 0x988   :  { %2185 = vrcp.f32 %v829_v43 }
 0x98a   :  { %v2184_v44 = vpop.eup %2183 }
 0x98b   :  { %v717_v45 = vmul.f32 2.0, %v2184_v44  ;;  %v719_v54 = vmul.f32 %v2184_v44, %v2457_v63 }
 0x98d   :  { %v1779_v46 = vadd.f32 -1.0, %v717_v45 }
 0x98f   :  { %721 = vrot.lane.b32.xlu0 %v1779_v46, %s2255_s19 }
 0x992   :  { %v2186_v47 = vpop.eup %2185 }
 0x993   :  { %v832_v48 = vmul.f32 2.0, %v2186_v47  ;;  %v834_v57 = vmul.f32 %v2186_v47, %v2461_v7 }
 0x995   :  { %v1783_v49 = vadd.f32 -1.0, %v832_v48 }
 0x997   :  { %836 = vrot.lane.b32.xlu1 %v1783_v49, %s2255_s19 }
 0xa01   :  { %v722_v50 = vpop.permute.xlu0 %721 }
 0xa02   :  { %v724_v51 = vmul.f32 %v2184_v44, %v722_v50 }
 0xa04   :  { %726 = vrot.lane.b32.xlu0 %v724_v51, %s2255_s19 }
 0xa09   :  { %v837_v52 = vpop.permute.xlu1 %836 }
 0xa0a   :  { %v839_v53 = vmul.f32 %v2186_v47, %v837_v52 }
 0xa0c   :  { %841 = vrot.lane.b32.xlu1 %v839_v53, %s2255_s19 }
 0xa76   :  { %v727_v55 = vpop.permute.xlu0 %726 }
 0xa77   :  { %v2500_v56 = vadd.f32 %v727_v55, %v719_v54 }
 0xa79   :  { %2187 = vtanh.f32 %v2500_v56 }
 0xa7e   :  { %v842_v58 = vpop.permute.xlu1 %841 }
 0xa7f   :  { %v2504_v59 = vadd.f32 %v842_v58, %v834_v57  ;;  %v40_v58 = vld [vmem:[%s2714_s0 + $0xa] sm:$0x3] }
 0xa81   :  { %2189 = vtanh.f32 %v2504_v59 }
 0xa83   :  { %v2188_v60 = vpop.eup %2187 }
 0xa84   :  { %732 = vrot.lane.b32.xlu0 %v2188_v60, %s2255_s19 }
 0xa8b   :  { %v2190_v61 = vpop.eup %2189 }
 0xa8c   :  { %847 = vrot.lane.b32.xlu1 %v2190_v61, %s2255_s19 }
 0xaf6   :  { %v733_v62 = vpop.permute.xlu0 %732 }
 0xaf7   :  { %v735_v63 = vmul.f32 %v2184_v44, %v733_v62 }
 0xaf9   :  { %v736_v2 = vpack.c.bf16 %v735_v63, %v735_v63 }
 0xafb   :  { %738 = vrot.lane.b32.xlu0 %v736_v2, %s2256_s29 }
 0xafe   :  { %v848_v7 = vpop.permute.xlu1 %847 }
 0xaff   :  { %v850_v8 = vmul.f32 %v2186_v47, %v848_v7  ;;  %66 = vperm.xlu0 %2139, %v39_v4  }
 0xb01   :  { %v851_v9 = vpack.c.bf16 %v850_v8, %v850_v8 }
 0xb03   :  { %853 = vrot.lane.b32.xlu1 %v851_v9, %s2256_s29 }
 0xb6d   :  { %v739_v10 = vpop.permute.xlu0 %738 }
 0xb6e   :  { %1971 = vmatmul.mubr.msk.bf16.vlgmr.msra.gmra.mrb[12].mxu1 %vm152_vm1, %v739_v10 }
 0xb6f   :  { %1983 = vmatpush3.bf16.msra.mxu1 %v2367_v29  ;;  %1986 = vmatprep.mubr.msk.bf16.mxu1 %vm2253_vm0, %v2252_v0 }
 0xb70   :  { %1984 = vmatprep.subr.bf16.mxu1 %v2252_v0 }
 0xb73   :  { %1985 = vmatpush3.bf16.msra.mxu1 %v2377_v31 }
 0xb74   :  { %1998 = vmatprep.subr.bf16.mxu1 %v2252_v0 }
 0xb75   :  { %v854_v11 = vpop.permute.xlu1 %853 }
 0xb7a   :  { %1987 = vmatmul.mubr.msk.bf16.vlgmr.msra.gmra.mrb[12].mxu1 %vm152_vm1, %v854_v11 }
 0xb7b   :  { %1999 = vmatpush3.bf16.msra.mxu1 %v2311_v1  ;;  %2002 = vmatprep.mubr.msk.bf16.mxu1 %vm2253_vm0, %v2252_v0 }
 0xb7c   :  { %2000 = vmatprep.subr.bf16.mxu1 %v2252_v0 }
 0xb7e   :  { %v67_v12 = vpop.permute.xlu0 %66 }
 0xb7f   :  { %v94_v13 = vmul.f32 %v2335_v5, %v67_v12  ;;  %2001 = vmatpush3.bf16.msra.mxu1 %v2320_v3 }
 0xb80   :  { %2014 = vmatprep.subr.bf16.mxu1 %v2252_v0 }
 0xb81   :  { %v109_v14 = vadd.f32 %v2340_v6, %v94_v13 }
 0xb82   :  { %2003 = vmatmul.mubr.msk.bf16.vlgmr.msra.gmra.mrb[16].mxu1 %vm152_vm1, %v854_v11 }
 0xb83   :  { %117 = vst [vmem:[#allocation2 + $0x8] sm:$0x3] %v109_v14  ;;  %2015 = vmatpush3.bf16.msra.mxu1 %v2352_v27  ;;  %2018 = vmatprep.mubr.msk.bf16.mxu1 %vm2253_vm0, %v2252_v0 }
 0xb84   :  { %2016 = vmatprep.subr.bf16.mxu1 %v2252_v0 }
 0xb87   :  { %2017 = vmatpush3.bf16.msra.mxu1 %v2358_v28 }
 0xb88   :  { %2030 = vmatprep.subr.bf16.mxu1 %v2252_v0 }
 0xb8a   :  { %v972_v21 = vld [vmem:[#allocation2 + $0x8] sm:$0x3] }
 0xc4d   :  { %v892_v15 = vpop.f32.mrb[12].mxu1 }
 0xc4e   :  { %v2097_v16 = vadd.f32 %v2407_v40, %v892_v15  ;;  %v1988_v17 = vpop.f32.mrb[13].mxu1 }
 0xc4f   :  { %v895_v18 = vpop.f32.mrb[14].mxu1 }
 0xc50   :  { %v1785_v19 = vmul.f32 -1.442695, %v2097_v16  ;;  %v1989_v20 = vpop.f32.mrb[15].mxu1 }
 0xc52   :  { %2191 = vpow2.f32 %v1785_v19 }
 0xc55   :  { %v1007_v22 = vpop.f32.mrb[16].mxu1 }
 0xc56   :  { %v1013_v23 = vadd.f32 %v1007_v22, %v972_v21  ;;  %v2004_v24 = vpop.f32.mrb[17].mxu1 }
 0xc57   :  { %v1010_v25 = vpop.f32.mrb[18].mxu1 }
 0xc58   :  { %v1789_v26 = vmul.f32 -1.442695, %v1013_v23  ;;  %v2005_v30 = vpop.f32.mrb[19].mxu1 }
 0xc5a   :  { %2193 = vpow2.f32 %v1789_v26 }
 0xc5c   :  { %v2192_v32 = vpop.eup %2191 }
 0xc5d   :  { %v902_v33 = vadd.f32 1.0, %v2192_v32 }
 0xc5f   :  { %2195 = vrcp.f32 %v902_v33 }
 0xc64   :  { %v2194_v34 = vpop.eup %2193 }
 0xc65   :  { %v1017_v35 = vadd.f32 1.0, %v2194_v34 }
 0xc67   :  { %2197 = vrcp.f32 %v1017_v35 }
 0xc69   :  { %v2196_v36 = vpop.eup %2195 }
 0xc6a   :  { %v905_v37 = vmul.f32 2.0, %v2196_v36  ;;  %v907_v47 = vmul.f32 %v2196_v36, %v2500_v56 }
 0xc6c   :  { %v1786_v38 = vadd.f32 -1.0, %v905_v37 }
 0xc6e   :  { %909 = vrot.lane.b32.xlu1 %v1786_v38, %s2255_s19 }
 0xc71   :  { %v2198_v39 = vpop.eup %2197 }
 0xc72   :  { %v1020_v41 = vmul.f32 2.0, %v2198_v39  ;;  %v1022_v50 = vmul.f32 %v2198_v39, %v2504_v59 }
 0xc74   :  { %v1790_v42 = vadd.f32 -1.0, %v1020_v41 }
 0xc76   :  { %1024 = vrot.lane.b32.xlu0 %v1790_v42, %s2255_s19 }
 0xce0   :  { %v910_v43 = vpop.permute.xlu1 %909 }
 0xce1   :  { %v912_v44 = vmul.f32 %v2196_v36, %v910_v43 }
 0xce3   :  { %914 = vrot.lane.b32.xlu1 %v912_v44, %s2255_s19 }
 0xce8   :  { %v1025_v45 = vpop.permute.xlu0 %1024 }
 0xce9   :  { %v1027_v46 = vmul.f32 %v2198_v39, %v1025_v45 }
 0xceb   :  { %1029 = vrot.lane.b32.xlu0 %v1027_v46, %s2255_s19 }
 0xd55   :  { %v915_v48 = vpop.permute.xlu1 %914 }
 0xd56   :  { %v2543_v49 = vadd.f32 %v915_v48, %v907_v47 }
 0xd58   :  { %2199 = vtanh.f32 %v2543_v49 }
 0xd5d   :  { %v1030_v51 = vpop.permute.xlu0 %1029 }
 0xd5e   :  { %v2547_v52 = vadd.f32 %v1030_v51, %v1022_v50  ;;  %v41_v51 = vld [vmem:[%s2714_s0 + $0xc] sm:$0x3] }
 0xd60   :  { %2201 = vtanh.f32 %v2547_v52 }
 0xd62   :  { %v2200_v53 = vpop.eup %2199 }
 0xd63   :  { %920 = vrot.lane.b32.xlu1 %v2200_v53, %s2255_s19 }
 0xd6a   :  { %v2202_v54 = vpop.eup %2201 }
 0xd6b   :  { %1035 = vrot.lane.b32.xlu0 %v2202_v54, %s2255_s19 }
 0xdd5   :  { %v921_v55 = vpop.permute.xlu1 %920 }
 0xdd6   :  { %v923_v56 = vmul.f32 %v2196_v36, %v921_v55 }
 0xdd8   :  { %v924_v57 = vpack.c.bf16 %v923_v56, %v923_v56 }
 0xdda   :  { %926 = vrot.lane.b32.xlu1 %v924_v57, %s2256_s29 }
 0xddd   :  { %v1036_v59 = vpop.permute.xlu0 %1035 }
 0xdde   :  { %v1038_v60 = vmul.f32 %v2198_v39, %v1036_v59  ;;  %71 = vperm.xlu1 %2140, %v40_v58  }
 0xde0   :  { %v1039_v61 = vpack.c.bf16 %v1038_v60, %v1038_v60 }
 0xde2   :  { %1041 = vrot.lane.b32.xlu0 %v1039_v61, %s2256_s29 }
 0xe4c   :  { %v927_v62 = vpop.permute.xlu1 %926 }
 0xe4d   :  { %1995 = vmatmul.mubr.msk.bf16.vlgmr.msra.gmra.mrb[16].mxu0 %vm152_vm1, %v927_v62 }
 0xe4e   :  { %2007 = vmatpush3.bf16.msra.mxu0 %v2367_v29  ;;  %2010 = vmatprep.mubr.msk.bf16.mxu0 %vm2253_vm0, %v2252_v0 }
 0xe4f   :  { %2008 = vmatprep.subr.bf16.mxu0 %v2252_v0 }
 0xe52   :  { %2009 = vmatpush3.bf16.msra.mxu0 %v2377_v31 }
 0xe53   :  { %2022 = vmatprep.subr.bf16.mxu0 %v2252_v0 }
 0xe54   :  { %v1042_v63 = vpop.permute.xlu0 %1041 }
 0xe59   :  { %2011 = vmatmul.mubr.msk.bf16.vlgmr.msra.gmra.mrb[16].mxu0 %vm152_vm1, %v1042_v63 }
 0xe5a   :  { %2023 = vmatpush3.bf16.msra.mxu0 %v2311_v1  ;;  %2026 = vmatprep.mubr.msk.bf16.mxu0 %vm2253_vm0, %v2252_v0 }
 0xe5b   :  { %2024 = vmatprep.subr.bf16.mxu0 %v2252_v0 }
 0xe5d   :  { %v72_v2 = vpop.permute.xlu1 %71 }
 0xe5e   :  { %v95_v4 = vmul.f32 %v2335_v5, %v72_v2  ;;  %2025 = vmatpush3.bf16.msra.mxu0 %v2320_v3 }
 0xe5f   :  { %2038 = vmatprep.subr.bf16.mxu0 %v2252_v0 }
 0xe60   :  { %v110_v7 = vadd.f32 %v2340_v6, %v95_v4 }
 0xe61   :  { %2027 = vmatmul.mubr.msk.bf16.vlgmr.msra.gmra.mrb[20].mxu0 %vm152_vm1, %v1042_v63 }
 0xe62   :  { %118 = vst [vmem:[#allocation2 + $0xa] sm:$0x3] %v110_v7  ;;  %2039 = vmatpush3.bf16.msra.mxu0 %v2352_v27  ;;  %2042 = vmatprep.mubr.msk.bf16.mxu0 %vm2253_vm0, %v2252_v0 }
 0xe63   :  { %2040 = vmatprep.subr.bf16.mxu0 %v2252_v0 }
 0xe66   :  { %2041 = vmatpush3.bf16.msra.mxu0 %v2358_v28 }
 0xe67   :  { %2054 = vmatprep.subr.bf16.mxu0 %v2252_v0 }
 0xe69   :  { %v1160_v14 = vld [vmem:[#allocation2 + $0xa] sm:$0x3] }
 0xf2c   :  { %v1080_v8 = vpop.f32.mrb[16].mxu0 }
 0xf2d   :  { %v2098_v9 = vadd.f32 %v2407_v40, %v1080_v8  ;;  %v2012_v10 = vpop.f32.mrb[17].mxu0 }
 0xf2e   :  { %v1083_v11 = vpop.f32.mrb[18].mxu0 }
 0xf2f   :  { %v1792_v12 = vmul.f32 -1.442695, %v2098_v9  ;;  %v2013_v13 = vpop.f32.mrb[19].mxu0 }
 0xf31   :  { %2203 = vpow2.f32 %v1792_v12 }
 0xf34   :  { %v1195_v15 = vpop.f32.mrb[20].mxu0 }
 0xf35   :  { %v1201_v16 = vadd.f32 %v1195_v15, %v1160_v14  ;;  %v2028_v17 = vpop.f32.mrb[21].mxu0 }
 0xf36   :  { %v1198_v18 = vpop.f32.mrb[22].mxu0 }
 0xf37   :  { %v1796_v19 = vmul.f32 -1.442695, %v1201_v16  ;;  %v2029_v20 = vpop.f32.mrb[23].mxu0 }
 0xf39   :  { %2205 = vpow2.f32 %v1796_v19 }
 0xf3b   :  { %v2204_v21 = vpop.eup %2203 }
 0xf3c   :  { %v1090_v22 = vadd.f32 1.0, %v2204_v21 }
 0xf3e   :  { %2207 = vrcp.f32 %v1090_v22 }
 0xf43   :  { %v2206_v23 = vpop.eup %2205 }
 0xf44   :  { %v1205_v24 = vadd.f32 1.0, %v2206_v23 }
 0xf46   :  { %2209 = vrcp.f32 %v1205_v24 }
 0xf48   :  { %v2208_v25 = vpop.eup %2207 }
 0xf49   :  { %v1093_v26 = vmul.f32 2.0, %v2208_v25  ;;  %v1095_v39 = vmul.f32 %v2208_v25, %v2543_v49 }
 0xf4b   :  { %v1793_v30 = vadd.f32 -1.0, %v1093_v26 }
 0xf4d   :  { %1097 = vrot.lane.b32.xlu0 %v1793_v30, %s2255_s19 }
 0xf50   :  { %v2210_v32 = vpop.eup %2209 }
 0xf51   :  { %v1208_v33 = vmul.f32 2.0, %v2210_v32  ;;  %v1210_v43 = vmul.f32 %v2210_v32, %v2547_v52 }
 0xf53   :  { %v1797_v34 = vadd.f32 -1.0, %v1208_v33 }
 0xf55   :  { %1212 = vrot.lane.b32.xlu1 %v1797_v34, %s2255_s19 }
 0xfbf   :  { %v1098_v35 = vpop.permute.xlu0 %1097 }
 0xfc0   :  { %v1100_v36 = vmul.f32 %v2208_v25, %v1098_v35 }
 0xfc2   :  { %1102 = vrot.lane.b32.xlu0 %v1100_v36, %s2255_s19 }
 0xfc7   :  { %v1213_v37 = vpop.permute.xlu1 %1212 }
 0xfc8   :  { %v1215_v38 = vmul.f32 %v2210_v32, %v1213_v37  ;;  %v42_v37 = vld [vmem:[%s2714_s0 + $0xe] sm:$0x3] }
 0xfca   :  { %1217 = vrot.lane.b32.xlu1 %v1215_v38, %s2255_s19 }
0x1034   :  { %v1103_v41 = vpop.permute.xlu0 %1102 }
0x1035   :  { %v2586_v42 = vadd.f32 %v1103_v41, %v1095_v39 }
0x1037   :  { %2211 = vtanh.f32 %v2586_v42 }
0x103c   :  { %v1218_v44 = vpop.permute.xlu1 %1217 }
0x103d   :  { %v2590_v45 = vadd.f32 %v1218_v44, %v1210_v43  ;;  %v2245_v44 = vld [vmem:[%s2713_s3] sm:$0xff]  }
0x103f   :  { %2213 = vtanh.f32 %v2590_v45 }
0x1041   :  { %v2212_v46 = vpop.eup %2211 }
0x1042   :  { %1108 = vrot.lane.b32.xlu0 %v2212_v46, %s2255_s19  ;;  %v2247_v46 = vld [vmem:[%s2713_s3 + $0x8] sm:$0xff]  }
0x1049   :  { %v2214_v47 = vpop.eup %2213 }
0x104a   :  { %1223 = vrot.lane.b32.xlu1 %v2214_v47, %s2255_s19  ;;  %v2248_v47 = vld [vmem:[%s2716_s2] ss:$0 sm:$0xff] }
0x10b4   :  { %v1109_v48 = vpop.permute.xlu0 %1108 }
0x10b5   :  { %v1111_v49 = vmul.f32 %v2208_v25, %v1109_v48 }
0x10b7   :  { %v1112_v50 = vpack.c.bf16 %v1111_v49, %v1111_v49 }
0x10b9   :  { %1114 = vrot.lane.b32.xlu0 %v1112_v50, %s2256_s29 }
0x10bc   :  { %v1224_v52 = vpop.permute.xlu1 %1223 }
0x10bd   :  { %v1226_v53 = vmul.f32 %v2210_v32, %v1224_v52  ;;  %76 = vperm.xlu0 %2139, %v41_v51  }
0x10bf   :  { %v1227_v54 = vpack.c.bf16 %v1226_v53, %v1226_v53 }
0x10c1   :  { %1229 = vrot.lane.b32.xlu1 %v1227_v54, %s2256_s29 }
0x112b   :  { %v1115_v55 = vpop.permute.xlu0 %1114 }
0x112c   :  { %2019 = vmatmul.mubr.msk.bf16.vlgmr.msra.gmra.mrb[20].mxu1 %vm152_vm1, %v1115_v55 }
0x112d   :  { %2031 = vmatpush3.bf16.msra.mxu1 %v2367_v29  ;;  %2034 = vmatprep.mubr.msk.bf16.mxu1 %vm2253_vm0, %v2252_v0 }
0x112e   :  { %2032 = vmatprep.subr.bf16.mxu1 %v2252_v0 }
0x1131   :  { %2033 = vmatpush3.bf16.msra.mxu1 %v2377_v31 }
0x1132   :  { %2046 = vmatprep.subr.bf16.mxu1 %v2252_v0 }
0x1133   :  { %v1230_v56 = vpop.permute.xlu1 %1229 }
0x1138   :  { %2035 = vmatmul.mubr.msk.bf16.vlgmr.msra.gmra.mrb[20].mxu1 %vm152_vm1, %v1230_v56 }
0x1139   :  { %2047 = vmatpush3.bf16.msra.mxu1 %v2311_v1  ;;  %2050 = vmatprep.mubr.msk.bf16.mxu1 %vm2253_vm0, %v2252_v0 }
0x113a   :  { %2048 = vmatprep.subr.bf16.mxu1 %v2252_v0 }
0x113c   :  { %v77_v57 = vpop.permute.xlu0 %76 }
0x113d   :  { %v96_v58 = vmul.f32 %v2335_v5, %v77_v57  ;;  %2049 = vmatpush3.bf16.msra.mxu1 %v2320_v3 }
0x113e   :  { %2062 = vmatprep.subr.bf16.mxu1 %v2252_v0 }
0x113f   :  { %v111_v59 = vadd.f32 %v2340_v6, %v96_v58 }
0x1140   :  { %2051 = vmatmul.mubr.msk.bf16.vlgmr.msra.gmra.mrb[24].mxu1 %vm152_vm1, %v1230_v56 }
0x1141   :  { %119 = vst [vmem:[#allocation2 + $0xc] sm:$0x3] %v111_v59  ;;  %2063 = vmatpush3.bf16.msra.mxu1 %v2352_v27  ;;  %2066 = vmatprep.mubr.msk.bf16.mxu1 %vm2253_vm0, %v2252_v0 }
0x1142   :  { %2064 = vmatprep.subr.bf16.mxu1 %v2252_v0 }
0x1145   :  { %2065 = vmatpush3.bf16.msra.mxu1 %v2358_v28 }
0x1146   :  { %2078 = vmatprep.subr.bf16.mxu1 %v2252_v0 }
0x1148   :  { %v1348_v62 = vld [vmem:[#allocation2 + $0xc] sm:$0x3] }
0x120b   :  { %v1268_v1 = vpop.f32.mrb[20].mxu1 }
0x120c   :  { %v2099_v3 = vadd.f32 %v2407_v40, %v1268_v1  ;;  %v2036_v5 = vpop.f32.mrb[21].mxu1 }
0x120d   :  { %v1271_v60 = vpop.f32.mrb[22].mxu1 }
0x120e   :  { %v1799_v6 = vmul.f32 -1.442695, %v2099_v3  ;;  %v2037_v61 = vpop.f32.mrb[23].mxu1 }
0x1210   :  { %2215 = vpow2.f32 %v1799_v6 }
0x1213   :  { %v1383_v63 = vpop.f32.mrb[24].mxu1 }
0x1214   :  { %v1389_v27 = vadd.f32 %v1383_v63, %v1348_v62  ;;  %v2052_v2 = vpop.f32.mrb[25].mxu1 }
0x1215   :  { %v1386_v4 = vpop.f32.mrb[26].mxu1 }
0x1216   :  { %v1803_v7 = vmul.f32 -1.442695, %v1389_v27  ;;  %v2053_v8 = vpop.f32.mrb[27].mxu1 }
0x1218   :  { %2217 = vpow2.f32 %v1803_v7 }
0x121a   :  { %v2216_v9 = vpop.eup %2215 }
0x121b   :  { %v1278_v28 = vadd.f32 1.0, %v2216_v9 }
0x121d   :  { %2219 = vrcp.f32 %v1278_v28 }
0x1222   :  { %v2218_v10 = vpop.eup %2217 }
0x1223   :  { %v1393_v11 = vadd.f32 1.0, %v2218_v10 }
0x1225   :  { %2221 = vrcp.f32 %v1393_v11 }
0x1227   :  { %v2220_v12 = vpop.eup %2219 }
0x1228   :  { %v1281_v13 = vmul.f32 2.0, %v2220_v12  ;;  %v1283_v22 = vmul.f32 %v2220_v12, %v2586_v42 }
0x122a   :  { %v1800_v14 = vadd.f32 -1.0, %v1281_v13 }
0x122c   :  { %1285 = vrot.lane.b32.xlu1 %v1800_v14, %s2255_s19 }
0x122f   :  { %v2222_v15 = vpop.eup %2221 }
0x1230   :  { %v1396_v16 = vmul.f32 2.0, %v2222_v15  ;;  %v1398_v25 = vmul.f32 %v2222_v15, %v2590_v45 }
0x1232   :  { %v1804_v17 = vadd.f32 -1.0, %v1396_v16 }
0x1234   :  { %1400 = vrot.lane.b32.xlu0 %v1804_v17, %s2255_s19 }
0x129e   :  { %v1286_v18 = vpop.permute.xlu1 %1285 }
0x129f   :  { %v1288_v19 = vmul.f32 %v2220_v12, %v1286_v18 }
0x12a1   :  { %1290 = vrot.lane.b32.xlu1 %v1288_v19, %s2255_s19 }
0x12a6   :  { %v1401_v20 = vpop.permute.xlu0 %1400 }
0x12a7   :  { %v1403_v21 = vmul.f32 %v2222_v15, %v1401_v20 }
0x12a9   :  { %1405 = vrot.lane.b32.xlu0 %v1403_v21, %s2255_s19 }
0x1313   :  { %v1291_v23 = vpop.permute.xlu1 %1290 }
0x1314   :  { %v2629_v24 = vadd.f32 %v1291_v23, %v1283_v22 }
0x1316   :  { %2223 = vtanh.f32 %v2629_v24 }
0x131b   :  { %v1406_v26 = vpop.permute.xlu0 %1405 }
0x131c   :  { %v2633_v30 = vadd.f32 %v1406_v26, %v1398_v25  ;;  %v2249_v25 = vld [vmem:[%s2718_s4] sm:$0xff]   ;;  %v2250_v26 = vld [vmem:[%s2718_s4 + $0x8] sm:$0xff]  }
0x131e   :  { %2225 = vtanh.f32 %v2633_v30 }
0x1320   :  { %v2224_v32 = vpop.eup %2223 }
0x1321   :  { %1296 = vrot.lane.b32.xlu1 %v2224_v32, %s2255_s19 }
0x1328   :  { %v2226_v33 = vpop.eup %2225 }
0x1329   :  { %1411 = vrot.lane.b32.xlu0 %v2226_v33, %s2255_s19  ;;  %v2251_v33 = vld [vmem:[%s2719_s6] ss:$0 sm:$0xff] }
0x1393   :  { %v1297_v34 = vpop.permute.xlu1 %1296 }
0x1394   :  { %v1299_v35 = vmul.f32 %v2220_v12, %v1297_v34 }
0x1396   :  { %v1300_v36 = vpack.c.bf16 %v1299_v35, %v1299_v35 }
0x1398   :  { %1302 = vrot.lane.b32.xlu1 %v1300_v36, %s2256_s29 }
0x139b   :  { %v1412_v38 = vpop.permute.xlu0 %1411 }
0x139c   :  { %v1414_v39 = vmul.f32 %v2222_v15, %v1412_v38  ;;  %81 = vperm.xlu1 %2140, %v42_v37  }
0x139e   :  { %v1415_v41 = vpack.c.bf16 %v1414_v39, %v1414_v39 }
0x13a0   :  { %1417 = vrot.lane.b32.xlu0 %v1415_v41, %s2256_s29 }
0x140a   :  { %v1303_v42 = vpop.permute.xlu1 %1302 }
0x140b   :  { %2043 = vmatmul.mubr.msk.bf16.vlgmr.msra.gmra.mrb[24].mxu0 %vm152_vm1, %v1303_v42 }
0x140c   :  { %2055 = vmatpush3.bf16.msra.mxu0 %v2367_v29  ;;  %2058 = vmatprep.mubr.msk.bf16.mxu0 %vm2253_vm0, %v2252_v0 }
0x140d   :  { %2056 = vmatprep.subr.bf16.mxu0 %v2252_v0 }
0x1410   :  { %2057 = vmatpush3.bf16.msra.mxu0 %v2377_v31  ;;  %v2246_v31 = vld [vmem:[%s2715_s1] ss:$0 sm:$0xff] }
0x1411   :  { %2070 = vmatprep.subr.bf16.mxu0 %v2252_v0 }
0x1412   :  { %v1418_v43 = vpop.permute.xlu0 %1417 }
0x1417   :  { %2059 = vmatmul.mubr.msk.bf16.vlgmr.msra.gmra.mrb[24].mxu0 %vm152_vm1, %v1418_v43 }
0x1418   :  { %2071 = vmatpush3.bf16.msra.mxu0 %v2245_v44  ;;  %2074 = vmatprep.mubr.msk.bf16.mxu0 %vm2253_vm0, %v2252_v0 }
0x1419   :  { %2072 = vmatprep.subr.bf16.mxu0 %v2252_v0 }
0x141b   :  { %v82_v29 = vpop.permute.xlu1 %81 }
0x141c   :  { %v97_v45 = vmul.f32 %v2246_v31, %v82_v29  ;;  %2073 = vmatpush3.bf16.msra.mxu0 %v2247_v46 }
0x141d   :  { %2086 = vmatprep.subr.bf16.mxu0 %v2252_v0 }
0x141e   :  { %v112_v48 = vadd.f32 %v2248_v47, %v97_v45 }
0x141f   :  { %2075 = vmatmul.mubr.msk.bf16.vlgmr.msra.gmra.mrb[28].mxu0 %vm152_vm1, %v1418_v43 }
0x1420   :  { %120 = vst [vmem:[#allocation2 + $0xe] sm:$0x3] %v112_v48  ;;  %2090 = vmatprep.mubr.msk.bf16.mxu0 %vm2253_vm0, %v2252_v0  ;;  %v2147_v48 = vld [vmem:[%s2720_s7] sm:$0xff]  }
0x1421   :  { %2087 = vmatpush3.bf16.msra.mxu0 %v2147_v48 }
0x1422   :  { %2088 = vmatprep.subr.bf16.mxu0 %v2252_v0 }
0x1427   :  { %v1536_v55 = vld [vmem:[#allocation2 + $0xe] sm:$0x3] }
0x14ea   :  { %v1456_v49 = vpop.f32.mrb[24].mxu0 }
0x14eb   :  { %v2100_v50 = vadd.f32 %v2407_v40, %v1456_v49  ;;  %v2060_v51 = vpop.f32.mrb[25].mxu0  ;;  %v2148_v49 = vld [vmem:[%s2720_s7 + $0x8] sm:$0xff]  }
0x14ec   :  { %v1459_v52 = vpop.f32.mrb[26].mxu0  ;;  %2089 = vmatpush3.bf16.msra.mxu0 %v2148_v49  ;;  %v14_v51 = vstv %s2721_s8 }
0x14ed   :  { %v1806_v53 = vmul.f32 -1.442695, %v2100_v50  ;;  %v2061_v54 = vpop.f32.mrb[27].mxu0  ;;  %15 = vst [vmem:[#allocation3] sm:$0x1] %v14_v51 }
0x14ef   :  { %2227 = vpow2.f32 %v1806_v53 }
0x14f2   :  { %v1571_v56 = vpop.f32.mrb[28].mxu0 }
0x14f3   :  { %v1577_v57 = vadd.f32 %v1571_v56, %v1536_v55  ;;  %v2076_v58 = vpop.f32.mrb[29].mxu0 }
0x14f4   :  { %v1574_v59 = vpop.f32.mrb[30].mxu0  ;;  %v1815_v56 = vld [vmem:[#allocation3] ss:$0 sm:$0xff] }
0x14f5   :  { %v1810_v1 = vmul.f32 -1.442695, %v1577_v57  ;;  %v2077_v3 = vpop.f32.mrb[31].mxu0 }
0x14f7   :  { %2229 = vpow2.f32 %v1810_v1 }
0x14f9   :  { %v2228_v5 = vpop.eup %2227 }
0x14fa   :  { %v1466_v60 = vadd.f32 1.0, %v2228_v5 }
0x14fc   :  { %2231 = vrcp.f32 %v1466_v60 }
0x1501   :  { %v2230_v6 = vpop.eup %2229 }
0x1502   :  { %v1581_v61 = vadd.f32 1.0, %v2230_v6 }
0x1504   :  { %2233 = vrcp.f32 %v1581_v61 }
0x1506   :  { %v2232_v40 = vpop.eup %2231 }
0x1507   :  { %v1469_v62 = vmul.f32 2.0, %v2232_v40  ;;  %v1471_v10 = vmul.f32 %v2232_v40, %v2629_v24 }
0x1509   :  { %v1807_v63 = vadd.f32 -1.0, %v1469_v62 }
0x150b   :  { %1473 = vrot.lane.b32.xlu0 %v1807_v63, %s2255_s19 }
0x150e   :  { %v2234_v27 = vpop.eup %2233 }
0x150f   :  { %v1584_v2 = vmul.f32 2.0, %v2234_v27  ;;  %v1586_v13 = vmul.f32 %v2234_v27, %v2633_v30 }
0x1511   :  { %v1811_v4 = vadd.f32 -1.0, %v1584_v2 }
0x1513   :  { %1588 = vrot.lane.b32.xlu1 %v1811_v4, %s2255_s19 }
0x157d   :  { %v1474_v7 = vpop.permute.xlu0 %1473 }
0x157e   :  { %v1476_v8 = vmul.f32 %v2232_v40, %v1474_v7 }
0x1580   :  { %1478 = vrot.lane.b32.xlu0 %v1476_v8, %s2255_s19 }
0x1585   :  { %v1589_v9 = vpop.permute.xlu1 %1588 }
0x1586   :  { %v1591_v28 = vmul.f32 %v2234_v27, %v1589_v9 }
0x1588   :  { %1593 = vrot.lane.b32.xlu1 %v1591_v28, %s2255_s19 }
0x15f2   :  { %v1479_v11 = vpop.permute.xlu0 %1478 }
0x15f3   :  { %v1481_v12 = vadd.f32 %v1479_v11, %v1471_v10 }
0x15f5   :  { %2235 = vtanh.f32 %v1481_v12 }
0x15fa   :  { %v1594_v14 = vpop.permute.xlu1 %1593 }
0x15fb   :  { %v1596_v15 = vadd.f32 %v1594_v14, %v1586_v13 }
0x15fd   :  { %2237 = vtanh.f32 %v1596_v15 }
0x15ff   :  { %v2236_v16 = vpop.eup %2235 }
0x1600   :  { %1484 = vrot.lane.b32.xlu0 %v2236_v16, %s2255_s19 }
0x1607   :  { %v2238_v17 = vpop.eup %2237 }
0x1608   :  { %1599 = vrot.lane.b32.xlu1 %v2238_v17, %s2255_s19 }
0x1672   :  { %v1485_v18 = vpop.permute.xlu0 %1484 }
0x1673   :  { %v1487_v19 = vmul.f32 %v2232_v40, %v1485_v18 }
0x1675   :  { %v1488_v20 = vpack.c.bf16 %v1487_v19, %v1487_v19 }
0x1677   :  { %1490 = vrot.lane.b32.xlu0 %v1488_v20, %s2256_s29 }
0x167a   :  { %v1600_v21 = vpop.permute.xlu1 %1599 }
0x167b   :  { %v1602_v22 = vmul.f32 %v2234_v27, %v1600_v21 }
0x167d   :  { %v1603_v23 = vpack.c.bf16 %v1602_v22, %v1602_v22 }
0x167f   :  { %1605 = vrot.lane.b32.xlu1 %v1603_v23, %s2256_s29 }
0x16e9   :  { %v1491_v24 = vpop.permute.xlu0 %1490 }
0x16ea   :  { %2067 = vmatmul.mubr.msk.bf16.vlgmr.msra.gmra.mrb[28].mxu1 %vm152_vm1, %v1491_v24 }
0x16eb   :  { %2079 = vmatpush3.bf16.msra.mxu1 %v2249_v25  ;;  %2082 = vmatprep.mubr.msk.bf16.mxu1 %vm2253_vm0, %v2252_v0 }
0x16ec   :  { %2080 = vmatprep.subr.bf16.mxu1 %v2252_v0 }
0x16ef   :  { %2081 = vmatpush3.bf16.msra.mxu1 %v2250_v26 }
0x16f1   :  { %v1606_v30 = vpop.permute.xlu1 %1605 }
0x16f6   :  { %2083 = vmatmul.mubr.msk.bf16.vlgmr.msra.gmra.mrb[28].mxu1 %vm152_vm1, %v1606_v30 }
0x17c9   :  { %v1644_v32 = vpop.f32.mrb[28].mxu1 }
0x17ca   :  { %v2101_v34 = vadd.f32 %v2251_v33, %v1644_v32  ;;  %v2084_v35 = vpop.f32.mrb[29].mxu1 }
0x17cb   :  { %v1647_v36 = vpop.f32.mrb[30].mxu1 }
0x17cc   :  { %v1813_v37 = vmul.f32 -1.442695, %v2101_v34  ;;  %v2085_v38 = vpop.f32.mrb[31].mxu1 }
0x17ce   :  { %2239 = vpow2.f32 %v1813_v37 }
0x17d8   :  { %v2240_v39 = vpop.eup %2239 }
0x17d9   :  { %v1654_v41 = vadd.f32 1.0, %v2240_v39 }
0x17db   :  { %2241 = vrcp.f32 %v1654_v41 }
0x17e5   :  { %v2242_v42 = vpop.eup %2241 }
0x17e6   :  { %v1657_v43 = vmul.f32 2.0, %v2242_v42  ;;  %v1659_v45 = vmul.f32 %v2242_v42, %v1481_v12 }
0x17e8   :  { %v1814_v44 = vadd.f32 -1.0, %v1657_v43 }
0x17ea   :  { %1661 = vrot.lane.b32.xlu0 %v1814_v44, %s2255_s19 }
0x185c   :  { %v1662_v29 = vpop.permute.xlu0 %1661 }
0x185d   :  { %v1664_v31 = vmul.f32 %v2242_v42, %v1662_v29 }
0x185f   :  { %1666 = vrot.lane.b32.xlu1 %v1664_v31, %s2255_s19 }
0x18d1   :  { %v1667_v46 = vpop.permute.xlu1 %1666 }
0x18d2   :  { %v1669_v47 = vadd.f32 %v1667_v46, %v1659_v45 }
0x18d4   :  { %2243 = vtanh.f32 %v1669_v47 }
0x18de   :  { %v2244_v50 = vpop.eup %2243 }
0x18df   :  { %1672 = vrot.lane.b32.xlu0 %v2244_v50, %s2255_s19 }
0x1951   :  { %v1673_v52 = vpop.permute.xlu0 %1672 }
0x1952   :  { %v1675_v53 = vmul.f32 %v2242_v42, %v1673_v52 }
0x1954   :  { %v1676_v54 = vpack.c.bf16 %v1675_v53, %v1675_v53 }
0x1956   :  { %1689 = vrot.lane.b32.xlu1 %v1676_v54, %s2256_s29 }
0x19c8   :  { %v1690_v55 = vpop.permute.xlu1 %1689 }
0x19c9   :  { %2091 = vmatmul.mubr.msk.bf16.vlgmr.msra.gmra.mrb[32].mxu0 %vm152_vm1, %v1690_v55 }
0x1a9c   :  { %v1740_v57 = vpop.f32.mrb[32].mxu0 }
0x1a9d   :  { %v1741_v0 = vadd.f32 %v1815_v56, %v1740_v57  ;;  %v2092_v58 = vpop.f32.mrb[33].mxu0 }
0x1a9e   :  { %v1743_v59 = vpop.f32.mrb[34].mxu0 }
0x1a9f   :  { %1747 = vst.msk [vmem:[%s2722_s9] sm:$0x3] %vm1746_vm2, %v1741_v0  ;;  %v2093_v1 = vpop.f32.mrb[35].mxu0 }

</bundles_post_ra>
